<compile_context>
chip_gen: v5e
topology: v5e:2x2
jax: 0.10.0
libtpu: 0.0.40
codegen_flags: <defaults>
</compile_context>

<pallas_src>
import jax
import jax.numpy as jnp
import numpy as np
from jax import lax
from jax.experimental import pallas as pl
from jax.experimental.pallas import tpu as pltpu

# Small synthetic CLIP-text-tower config.
B, L, D, H, E, NL = 2, 8, 32, 4, 16, 2     # batch, seq, width, heads, embed_dim, layers
HD = D // H                                # head dim
BT = 1                                     # sequences per ('parallel') batch-tile step
E_PAD = 128                                # lane-dense padded output width
EPS = 1e-5                                 # nn.LayerNorm default


def _layernorm(x, g, b):
    mu = jnp.mean(x, axis=-1, keepdims=True)
    var = jnp.mean((x - mu) ** 2, axis=-1, keepdims=True)
    return (x - mu) * lax.rsqrt(var + EPS) * g + b


def _split_heads(t):
    """(BT*L, D) -> (BT*H, L, HD) via static sublane/lane slices.
    TODO(synk): at production sizes replace the slice+stack with a single relayout
    (pltpu.einshape) to cut per-layer XLU/vst traffic."""
    return jnp.stack(
        [t[bt * L:(bt + 1) * L, hh * HD:(hh + 1) * HD]
         for bt in range(BT) for hh in range(H)], axis=0)


def _merge_heads(t):
    """(BT*H, L, HD) -> (BT*L, D)."""
    return jnp.concatenate(
        [jnp.concatenate([t[bt * H + hh] for hh in range(H)], axis=-1)
         for bt in range(BT)], axis=0)


def text_encoder_kernel(eot_ref,                      # scalar prefetch: (B,) int32
                        prompts_ref, pos_ref,
                        ln1_g_ref, ln1_b_ref, qkv_w_ref, qkv_b_ref,
                        out_w_ref, out_b_ref, ln2_g_ref, ln2_b_ref,
                        fc_w_ref, fc_b_ref, proj_w_ref, proj_b_ref,
                        lnf_g_ref, lnf_b_ref, tproj_ref,
                        o_ref, x_scratch):
    bf16 = jnp.bfloat16
    scale = 1.0 / (HD ** 0.5)
    bi = pl.program_id(0)                  # batch-tile index ('parallel')
    l = pl.program_id(1)                   # layer index      ('arbitrary')

    # ---- init residual stream on the first layer step ----
    @pl.when(l == 0)
    def _init():
        x_scratch[...] = (prompts_ref[...] + pos_ref[...]).reshape(BT * L, D)

    x = x_scratch[...]                                             # (BT*L, D) f32

    # Causal (L, L) additive mask, generated in-kernel (VPU iota/compare, no DMA).
    row = lax.broadcasted_iota(jnp.int32, (L, L), 0)
    col = lax.broadcasted_iota(jnp.int32, (L, L), 1)
    mask = jnp.where(col <= row, 0.0, -1e9).astype(jnp.float32)

    # ---- multi-head self-attention sub-block (per-sequence, head-batched) ----
    h = _layernorm(x, ln1_g_ref[0], ln1_b_ref[0])
    qkv = jnp.dot(h.astype(bf16), qkv_w_ref[0],
                  preferred_element_type=jnp.float32) + qkv_b_ref[0]   # (BT*L, 3D)
    qh = _split_heads(qkv[:, 0 * D:1 * D]).astype(bf16)            # (BT*H, L, HD)
    kh = _split_heads(qkv[:, 1 * D:2 * D]).astype(bf16)
    vh = _split_heads(qkv[:, 2 * D:3 * D]).astype(bf16)
    s = jnp.einsum('hld,hmd->hlm', qh, kh,
                   preferred_element_type=jnp.float32) * scale + mask[None]
    s = s - jnp.max(s, axis=-1, keepdims=True)
    p = jnp.exp(s)
    p = p / jnp.sum(p, axis=-1, keepdims=True)                      # exact softmax
    oh = jnp.einsum('hlm,hmd->hld', p.astype(bf16), vh,
                    preferred_element_type=jnp.float32)             # (BT*H, L, HD)
    o = _merge_heads(oh)                                            # (BT*L, D)
    x = x + (jnp.dot(o.astype(bf16), out_w_ref[0],
                     preferred_element_type=jnp.float32) + out_b_ref[0])

    # ---- MLP sub-block (Linear -> QuickGELU -> Linear) ----
    h2 = _layernorm(x, ln2_g_ref[0], ln2_b_ref[0])
    m = jnp.dot(h2.astype(bf16), fc_w_ref[0],
                preferred_element_type=jnp.float32) + fc_b_ref[0]
    m = m * jax.nn.sigmoid(1.702 * m)                               # QuickGELU (f32)
    m = jnp.dot(m.astype(bf16), proj_w_ref[0],
                preferred_element_type=jnp.float32) + proj_b_ref[0]
    x = x + m
    x_scratch[...] = x

    # ---- last layer: EOT gather -> ln_final (B rows only) -> text projection ----
    @pl.when(l == pl.num_programs(1) - 1)
    def _finalize():
        rows = [x_scratch[pl.ds(bt * L + eot_ref[bi * BT + bt], 1), :]
                for bt in range(BT)]
        pooled = jnp.concatenate(rows, axis=0)                      # (BT, D)
        pooled = _layernorm(pooled, lnf_g_ref[...], lnf_b_ref[...])
        o_ref[0] = jnp.dot(pooled.astype(bf16), tproj_ref[...],
                           preferred_element_type=jnp.float32)      # (BT, E_PAD)


LAYER_KEYS = ("ln1_g", "ln1_b", "qkv_w", "qkv_b", "out_w", "out_b",
              "ln2_g", "ln2_b", "fc_w", "fc_b", "proj_w", "proj_b")
BF16_LAYER_KEYS = ("qkv_w", "out_w", "fc_w", "proj_w")   # MXU operands -> bf16


def _layer_spec(a):
    """Stream per-layer weights along the NL grid axis (auto double-buffered)."""
    return pl.BlockSpec((1,) + a.shape[1:], lambda bi, l, eot: (l, 0, 0))


def _full_spec(a):
    nd = a.ndim
    return pl.BlockSpec(a.shape, lambda bi, l, eot, _n=nd: (0,) * _n)


def text_encoder(prompts, tokenized_prompts, params):
    eot = jnp.argmax(tokenized_prompts, axis=-1).astype(jnp.int32)       # (B,)
    layer_args = [params[k].astype(jnp.bfloat16) if k in BF16_LAYER_KEYS else params[k]
                  for k in LAYER_KEYS]
    # Lane-dense output: zero-pad text_projection to 128 columns, slice E back below.
    tproj_pad = (jnp.zeros((D, E_PAD), jnp.float32)
                 .at[:, :E].set(params["tproj"]).astype(jnp.bfloat16))
    final_args = [params["lnf_g"], params["lnf_b"], tproj_pad]

    in_specs = ([pl.BlockSpec((BT, L, D), lambda bi, l, eot: (bi, 0, 0)),
                 _full_spec(params["pos"])]
                + [_layer_spec(a) for a in layer_args]
                + [_full_spec(a) for a in final_args])

    out = pl.pallas_call(
        text_encoder_kernel,
        out_shape=jax.ShapeDtypeStruct((B // BT, BT, E_PAD), jnp.float32),
        grid_spec=pltpu.PrefetchScalarGridSpec(
            num_scalar_prefetch=1,
            grid=(B // BT, NL),                       # (batch tiles, layers)
            in_specs=in_specs,
            out_specs=pl.BlockSpec((1, BT, E_PAD), lambda bi, l, eot: (bi, 0, 0)),
            scratch_shapes=[pltpu.VMEM((BT * L, D), jnp.float32)],   # residual carry
        ),
        compiler_params=pltpu.CompilerParams(
            dimension_semantics=("parallel", "arbitrary"),
            vmem_limit_bytes=32 * 1024 * 1024,
        ),
    )(eot, prompts, params["pos"], *layer_args, *final_args)
    return out.reshape(B, E_PAD)[:, :E]


def init_params(key):
    ks = jax.random.split(key, 10)
    p = {}
    p["pos"] = 0.01 * jax.random.normal(ks[0], (L, D), jnp.float32)
    p["mask"] = jnp.triu(jnp.full((L, L), -1e9, jnp.float32), k=1)   # (L,L) causal (ref only)
    p["ln1_g"] = jnp.ones((NL, 1, D), jnp.float32)
    p["ln1_b"] = jnp.zeros((NL, 1, D), jnp.float32)
    p["qkv_w"] = (D ** -0.5) * jax.random.normal(ks[1], (NL, D, 3 * D), jnp.float32)
    p["qkv_b"] = 0.01 * jax.random.normal(ks[2], (NL, 1, 3 * D), jnp.float32)
    p["out_w"] = (D ** -0.5) * jax.random.normal(ks[3], (NL, D, D), jnp.float32)
    p["out_b"] = 0.01 * jax.random.normal(ks[4], (NL, 1, D), jnp.float32)
    p["ln2_g"] = jnp.ones((NL, 1, D), jnp.float32)
    p["ln2_b"] = jnp.zeros((NL, 1, D), jnp.float32)
    p["fc_w"] = (D ** -0.5) * jax.random.normal(ks[5], (NL, D, 4 * D), jnp.float32)
    p["fc_b"] = 0.01 * jax.random.normal(ks[6], (NL, 1, 4 * D), jnp.float32)
    p["proj_w"] = ((4 * D) ** -0.5) * jax.random.normal(ks[7], (NL, 4 * D, D), jnp.float32)
    p["proj_b"] = 0.01 * jax.random.normal(ks[8], (NL, 1, D), jnp.float32)
    p["lnf_g"] = jnp.ones((1, D), jnp.float32)
    p["lnf_b"] = jnp.zeros((1, D), jnp.float32)
    p["tproj"] = (D ** -0.5) * jax.random.normal(ks[9], (D, E), jnp.float32)
    return p


def reference(prompts, tokenized, p):
    """Pure-JAX mirror of the PyTorch forward with the same bf16-MXU / f32-accum policy."""
    bf = jnp.bfloat16

    def mm(a, w):
        return jnp.dot(a.astype(bf), w.astype(bf), preferred_element_type=jnp.float32)

    def seq_forward(x):
        x = x + p["pos"]
        for l in range(NL):
            h = _layernorm(x, p["ln1_g"][l], p["ln1_b"][l])
            qkv = mm(h, p["qkv_w"][l]) + p["qkv_b"][l]
            q, k, v = qkv[:, :D], qkv[:, D:2 * D], qkv[:, 2 * D:]
            heads = []
            for hh in range(H):
                sl = slice(hh * HD, (hh + 1) * HD)
                s = jnp.dot(q[:, sl].astype(bf), k[:, sl].astype(bf).T,
                            preferred_element_type=jnp.float32) / (HD ** 0.5) + p["mask"]
                pr = jax.nn.softmax(s, axis=-1)
                heads.append(jnp.dot(pr.astype(bf), v[:, sl].astype(bf),
                                     preferred_element_type=jnp.float32))
            attn = mm(jnp.concatenate(heads, axis=-1), p["out_w"][l]) + p["out_b"][l]
            x = x + attn
            h2 = _layernorm(x, p["ln2_g"][l], p["ln2_b"][l])
            m = mm(h2, p["fc_w"][l]) + p["fc_b"][l]
            m = m * jax.nn.sigmoid(1.702 * m)
            x = x + mm(m, p["proj_w"][l]) + p["proj_b"][l]
        return _layernorm(x, p["lnf_g"], p["lnf_b"])

    x = jax.vmap(seq_forward)(prompts)                 # (B, L, D)
    eot = jnp.argmax(tokenized, axis=-1)               # (B,)
    return jnp.dot(x[jnp.arange(B), eot].astype(bf), p["tproj"].astype(bf),
                   preferred_element_type=jnp.float32)


if __name__ == "__main__":
    key = jax.random.PRNGKey(0)
    kp, kt, kw = jax.random.split(key, 3)
    params = init_params(kw)

    prompts = jax.random.normal(kp, (B, L, D), jnp.float32)
    tokenized = jax.random.randint(kt, (B, L), 1, 100, dtype=jnp.int32)
    eot_pos = jnp.array([5, 3], dtype=jnp.int32)
    tokenized = tokenized.at[jnp.arange(B), eot_pos].set(49407)   # EOT = argmax token

    out = jax.block_until_ready(text_encoder(prompts, tokenized, params))
    ref = reference(prompts, tokenized, params)
    np.testing.assert_allclose(np.asarray(out), np.asarray(ref), rtol=2e-2, atol=2e-2)
    print("KERNEL_OK")
</pallas_src>

<mosaic_0001>
module attributes {stable_mosaic.version = 11 : i64} {
  func.func @text_encoder_kernel(%arg0: i32, %arg1: i32, %arg2: memref<2xi32, #tpu.memory_space<smem>>, %arg3: memref<1x8x32xf32, #tpu.memory_space<vmem>>, %arg4: memref<8x32xf32, #tpu.memory_space<vmem>>, %arg5: memref<1x1x32xf32, #tpu.memory_space<vmem>>, %arg6: memref<1x1x32xf32, #tpu.memory_space<vmem>>, %arg7: memref<1x32x96xbf16, #tpu.memory_space<vmem>>, %arg8: memref<1x1x96xf32, #tpu.memory_space<vmem>>, %arg9: memref<1x32x32xbf16, #tpu.memory_space<vmem>>, %arg10: memref<1x1x32xf32, #tpu.memory_space<vmem>>, %arg11: memref<1x1x32xf32, #tpu.memory_space<vmem>>, %arg12: memref<1x1x32xf32, #tpu.memory_space<vmem>>, %arg13: memref<1x32x128xbf16, #tpu.memory_space<vmem>>, %arg14: memref<1x1x128xf32, #tpu.memory_space<vmem>>, %arg15: memref<1x128x32xbf16, #tpu.memory_space<vmem>>, %arg16: memref<1x1x32xf32, #tpu.memory_space<vmem>>, %arg17: memref<1x32xf32, #tpu.memory_space<vmem>>, %arg18: memref<1x32xf32, #tpu.memory_space<vmem>>, %arg19: memref<32x128xbf16, #tpu.memory_space<vmem>>, %arg20: memref<1x1x128xf32, #tpu.memory_space<vmem>>, %arg21: memref<8x32xf32, #tpu.memory_space<vmem>>) attributes {dimension_semantics = [#tpu.dimension_semantics<parallel>, #tpu.dimension_semantics<arbitrary>], iteration_bounds = array<i64: 2, 2>, scalar_prefetch = 1 : i64, scratch_operands = 1 : i64, tpu.core_type = #tpu.core_type<tc>, window_params = [{transform_indices = @transform_0, window_bounds = array<i64: 1, 8, 32>}, {pipeline_mode = #tpu.pipeline_mode<synchronous>, transform_indices = @transform_1, window_bounds = array<i64: 8, 32>}, {transform_indices = @transform_2, window_bounds = array<i64: 1, 1, 32>}, {transform_indices = @transform_3, window_bounds = array<i64: 1, 1, 32>}, {transform_indices = @transform_4, window_bounds = array<i64: 1, 32, 96>}, {transform_indices = @transform_5, window_bounds = array<i64: 1, 1, 96>}, {transform_indices = @transform_6, window_bounds = array<i64: 1, 32, 32>}, {transform_indices = @transform_7, window_bounds = array<i64: 1, 1, 32>}, {transform_indices = @transform_8, window_bounds = array<i64: 1, 1, 32>}, {transform_indices = @transform_9, window_bounds = array<i64: 1, 1, 32>}, {transform_indices = @transform_10, window_bounds = array<i64: 1, 32, 128>}, {transform_indices = @transform_11, window_bounds = array<i64: 1, 1, 128>}, {transform_indices = @transform_12, window_bounds = array<i64: 1, 128, 32>}, {transform_indices = @transform_13, window_bounds = array<i64: 1, 1, 32>}, {pipeline_mode = #tpu.pipeline_mode<synchronous>, transform_indices = @transform_14, window_bounds = array<i64: 1, 32>}, {pipeline_mode = #tpu.pipeline_mode<synchronous>, transform_indices = @transform_15, window_bounds = array<i64: 1, 32>}, {pipeline_mode = #tpu.pipeline_mode<synchronous>, transform_indices = @transform_16, window_bounds = array<i64: 32, 128>}, {transform_indices = @transform_17, window_bounds = array<i64: 1, 1, 128>}]} {
    %c0_i32 = arith.constant 0 : i32
    %0 = arith.cmpi eq, %arg1, %c0_i32 : i32
    %1 = arith.extui %0 : i1 to i32
    %c0_i32_0 = arith.constant 0 : i32
    %2 = arith.cmpi ne, %1, %c0_i32_0 : i32
    scf.if %2 {
      %c0_63 = arith.constant 0 : index
      %c0_64 = arith.constant 0 : index
      %c0_65 = arith.constant 0 : index
      %167 = vector.load %arg3[%c0_63, %c0_64, %c0_65] : memref<1x8x32xf32, #tpu.memory_space<vmem>>, vector<1x8x32xf32>
      %c0_66 = arith.constant 0 : index
      %c0_67 = arith.constant 0 : index
      %168 = vector.load %arg4[%c0_66, %c0_67] : memref<8x32xf32, #tpu.memory_space<vmem>>, vector<8x32xf32>
      %169 = vector.shape_cast %168 : vector<8x32xf32> to vector<1x8x32xf32>
      %170 = arith.addf %167, %169 : vector<1x8x32xf32>
      %171 = vector.shape_cast %170 : vector<1x8x32xf32> to vector<8x32xf32>
      %c0_68 = arith.constant 0 : index
      %c0_69 = arith.constant 0 : index
      %172 = vector.load %arg21[%c0_68, %c0_69] : memref<8x32xf32, #tpu.memory_space<vmem>>, vector<8x32xf32>
      tpu.vector_store %arg21[%c0_68, %c0_69], %171 {strides = array<i32>} : memref<8x32xf32, #tpu.memory_space<vmem>>, vector<8x32xf32>,
    } else {
    }
    %c0 = arith.constant 0 : index
    %c0_1 = arith.constant 0 : index
    %3 = vector.load %arg21[%c0, %c0_1] : memref<8x32xf32, #tpu.memory_space<vmem>>, vector<8x32xf32>
    %4 = tpu.iota {dimensions = array<i32: 0>} : vector<8x8xi32>
    %5 = tpu.iota {dimensions = array<i32: 1>} : vector<8x8xi32>
    %6 = arith.cmpi sle, %5, %4 : vector<8x8xi32>
    %cst = arith.constant 0.000000e+00 : f32
    %cst_2 = arith.constant -1.000000e+09 : f32
    %7 = vector.broadcast %cst : f32 to vector<8x8xf32>
    %8 = vector.broadcast %cst_2 : f32 to vector<8x8xf32>
    %9 = arith.select %6, %7, %8 : vector<8x8xi1>, vector<8x8xf32>
    %c0_3 = arith.constant 0 : index
    %c0_4 = arith.constant 0 : index
    %c0_5 = arith.constant 0 : index
    %10 = vector.load %arg5[%c0_3, %c0_4, %c0_5] : memref<1x1x32xf32, #tpu.memory_space<vmem>>, vector<1x1x32xf32>
    %11 = vector.shape_cast %10 : vector<1x1x32xf32> to vector<1x32xf32>
    %c0_6 = arith.constant 0 : index
    %c0_7 = arith.constant 0 : index
    %c0_8 = arith.constant 0 : index
    %12 = vector.load %arg6[%c0_6, %c0_7, %c0_8] : memref<1x1x32xf32, #tpu.memory_space<vmem>>, vector<1x1x32xf32>
    %13 = vector.shape_cast %12 : vector<1x1x32xf32> to vector<1x32xf32>
    %cst_9 = arith.constant dense<0.000000e+00> : vector<8xf32>
    %14 = vector.multi_reduction <add>, %3, %cst_9 [1] : vector<8x32xf32> to vector<8xf32>
    %15 = vector.shape_cast %14 : vector<8xf32> to vector<8x1xf32>
    %cst_10 = arith.constant 3.200000e+01 : f32
    %16 = vector.broadcast %cst_10 : f32 to vector<8x1xf32>
    %17 = arith.divf %15, %16 : vector<8x1xf32>
    %18 = vector.broadcast %17 : vector<8x1xf32> to vector<8x32xf32>
    %19 = arith.subf %3, %18 : vector<8x32xf32>
    %20 = arith.mulf %19, %19 : vector<8x32xf32>
    %cst_11 = arith.constant dense<0.000000e+00> : vector<8xf32>
    %21 = vector.multi_reduction <add>, %20, %cst_11 [1] : vector<8x32xf32> to vector<8xf32>
    %22 = vector.shape_cast %21 : vector<8xf32> to vector<8x1xf32>
    %cst_12 = arith.constant 3.200000e+01 : f32
    %23 = vector.broadcast %cst_12 : f32 to vector<8x1xf32>
    %24 = arith.divf %22, %23 : vector<8x1xf32>
    %25 = vector.broadcast %17 : vector<8x1xf32> to vector<8x32xf32>
    %26 = arith.subf %3, %25 : vector<8x32xf32>
    %cst_13 = arith.constant 9.99999974E-6 : f32
    %27 = vector.broadcast %cst_13 : f32 to vector<8x1xf32>
    %28 = arith.addf %24, %27 : vector<8x1xf32>
    %29 = math.rsqrt %28 : vector<8x1xf32>
    %30 = vector.broadcast %29 : vector<8x1xf32> to vector<8x32xf32>
    %31 = arith.mulf %26, %30 : vector<8x32xf32>
    %32 = vector.broadcast %11 : vector<1x32xf32> to vector<8x32xf32>
    %33 = arith.mulf %31, %32 : vector<8x32xf32>
    %34 = vector.broadcast %13 : vector<1x32xf32> to vector<8x32xf32>
    %35 = arith.addf %33, %34 : vector<8x32xf32>
    %36 = arith.truncf %35 : vector<8x32xf32> to vector<8x32xbf16>
    %c0_14 = arith.constant 0 : index
    %c0_15 = arith.constant 0 : index
    %c0_16 = arith.constant 0 : index
    %37 = vector.load %arg7[%c0_14, %c0_15, %c0_16] : memref<1x32x96xbf16, #tpu.memory_space<vmem>>, vector<1x32x96xbf16>
    %38 = vector.shape_cast %37 : vector<1x32x96xbf16> to vector<32x96xbf16>
    %cst_17 = arith.constant dense<0.000000e+00> : vector<8x96xf32>
    %39 = tpu.matmul %36, %38, %cst_17 {dimension_numbers = #tpu.dot_dimension_numbers<[1], [0], [0], [1], [0, 0, 1, 1], [], []>} : vector<8x32xbf16>, vector<32x96xbf16>, vector<8x96xf32> -> vector<8x96xf32>
    %c0_18 = arith.constant 0 : index
    %c0_19 = arith.constant 0 : index
    %c0_20 = arith.constant 0 : index
    %40 = vector.load %arg8[%c0_18, %c0_19, %c0_20] : memref<1x1x96xf32, #tpu.memory_space<vmem>>, vector<1x1x96xf32>
    %41 = vector.shape_cast %40 : vector<1x1x96xf32> to vector<1x96xf32>
    %42 = vector.broadcast %41 : vector<1x96xf32> to vector<8x96xf32>
    %43 = arith.addf %39, %42 : vector<8x96xf32>
    %44 = vector.extract_strided_slice %43 {offsets = [0, 0], sizes = [8, 32], strides = [1, 1]} : vector<8x96xf32> to vector<8x32xf32>
    %45 = vector.extract_strided_slice %44 {offsets = [0, 0], sizes = [8, 8], strides = [1, 1]} : vector<8x32xf32> to vector<8x8xf32>
    %46 = vector.extract_strided_slice %44 {offsets = [0, 8], sizes = [8, 8], strides = [1, 1]} : vector<8x32xf32> to vector<8x8xf32>
    %47 = vector.extract_strided_slice %44 {offsets = [0, 16], sizes = [8, 8], strides = [1, 1]} : vector<8x32xf32> to vector<8x8xf32>
    %48 = vector.extract_strided_slice %44 {offsets = [0, 24], sizes = [8, 8], strides = [1, 1]} : vector<8x32xf32> to vector<8x8xf32>
    %49 = vector.shape_cast %45 : vector<8x8xf32> to vector<1x8x8xf32>
    %50 = vector.shape_cast %46 : vector<8x8xf32> to vector<1x8x8xf32>
    %51 = vector.shape_cast %47 : vector<8x8xf32> to vector<1x8x8xf32>
    %52 = vector.shape_cast %48 : vector<8x8xf32> to vector<1x8x8xf32>
    %53 = tpu.concatenate %49, %50, %51, %52 in 0 : vector<1x8x8xf32>, vector<1x8x8xf32>, vector<1x8x8xf32>, vector<1x8x8xf32> -> vector<4x8x8xf32>
    %54 = arith.truncf %53 : vector<4x8x8xf32> to vector<4x8x8xbf16>
    %55 = vector.extract_strided_slice %43 {offsets = [0, 32], sizes = [8, 32], strides = [1, 1]} : vector<8x96xf32> to vector<8x32xf32>
    %56 = vector.extract_strided_slice %55 {offsets = [0, 0], sizes = [8, 8], strides = [1, 1]} : vector<8x32xf32> to vector<8x8xf32>
    %57 = vector.extract_strided_slice %55 {offsets = [0, 8], sizes = [8, 8], strides = [1, 1]} : vector<8x32xf32> to vector<8x8xf32>
    %58 = vector.extract_strided_slice %55 {offsets = [0, 16], sizes = [8, 8], strides = [1, 1]} : vector<8x32xf32> to vector<8x8xf32>
    %59 = vector.extract_strided_slice %55 {offsets = [0, 24], sizes = [8, 8], strides = [1, 1]} : vector<8x32xf32> to vector<8x8xf32>
    %60 = vector.shape_cast %56 : vector<8x8xf32> to vector<1x8x8xf32>
    %61 = vector.shape_cast %57 : vector<8x8xf32> to vector<1x8x8xf32>
    %62 = vector.shape_cast %58 : vector<8x8xf32> to vector<1x8x8xf32>
    %63 = vector.shape_cast %59 : vector<8x8xf32> to vector<1x8x8xf32>
    %64 = tpu.concatenate %60, %61, %62, %63 in 0 : vector<1x8x8xf32>, vector<1x8x8xf32>, vector<1x8x8xf32>, vector<1x8x8xf32> -> vector<4x8x8xf32>
    %65 = arith.truncf %64 : vector<4x8x8xf32> to vector<4x8x8xbf16>
    %66 = vector.extract_strided_slice %43 {offsets = [0, 64], sizes = [8, 32], strides = [1, 1]} : vector<8x96xf32> to vector<8x32xf32>
    %67 = vector.extract_strided_slice %66 {offsets = [0, 0], sizes = [8, 8], strides = [1, 1]} : vector<8x32xf32> to vector<8x8xf32>
    %68 = vector.extract_strided_slice %66 {offsets = [0, 8], sizes = [8, 8], strides = [1, 1]} : vector<8x32xf32> to vector<8x8xf32>
    %69 = vector.extract_strided_slice %66 {offsets = [0, 16], sizes = [8, 8], strides = [1, 1]} : vector<8x32xf32> to vector<8x8xf32>
    %70 = vector.extract_strided_slice %66 {offsets = [0, 24], sizes = [8, 8], strides = [1, 1]} : vector<8x32xf32> to vector<8x8xf32>
    %71 = vector.shape_cast %67 : vector<8x8xf32> to vector<1x8x8xf32>
    %72 = vector.shape_cast %68 : vector<8x8xf32> to vector<1x8x8xf32>
    %73 = vector.shape_cast %69 : vector<8x8xf32> to vector<1x8x8xf32>
    %74 = vector.shape_cast %70 : vector<8x8xf32> to vector<1x8x8xf32>
    %75 = tpu.concatenate %71, %72, %73, %74 in 0 : vector<1x8x8xf32>, vector<1x8x8xf32>, vector<1x8x8xf32>, vector<1x8x8xf32> -> vector<4x8x8xf32>
    %76 = arith.truncf %75 : vector<4x8x8xf32> to vector<4x8x8xbf16>
    "tpu.trace_start"() <{level = 10 : i32, message = "hld,hmd->hlm"}> : () -> ()
    %cst_21 = arith.constant dense<0.000000e+00> : vector<4x8x8xf32>
    %77 = tpu.matmul %54, %65, %cst_21 {dimension_numbers = #tpu.dot_dimension_numbers<[2], [2], [1], [1], [0, 0, 0, 1, 1, 1], [0], [0]>} : vector<4x8x8xbf16>, vector<4x8x8xbf16>, vector<4x8x8xf32> -> vector<4x8x8xf32>
    "tpu.trace_stop"() : () -> ()
    %cst_22 = arith.constant 0.353553385 : f32
    %78 = vector.broadcast %cst_22 : f32 to vector<4x8x8xf32>
    %79 = arith.mulf %77, %78 : vector<4x8x8xf32>
    %80 = vector.shape_cast %9 : vector<8x8xf32> to vector<1x8x8xf32>
    %81 = vector.broadcast %80 : vector<1x8x8xf32> to vector<4x8x8xf32>
    %82 = arith.addf %79, %81 : vector<4x8x8xf32>
    %cst_23 = arith.constant dense<0xFF800000> : vector<4x8xf32>
    %83 = vector.multi_reduction <maximumf>, %82, %cst_23 [2] : vector<4x8x8xf32> to vector<4x8xf32>
    %84 = vector.shape_cast %83 : vector<4x8xf32> to vector<4x8x1xf32>
    %85 = vector.broadcast %84 : vector<4x8x1xf32> to vector<4x8x8xf32>
    %86 = arith.subf %82, %85 : vector<4x8x8xf32>
    %87 = math.exp %86 : vector<4x8x8xf32>
    %cst_24 = arith.constant dense<0.000000e+00> : vector<4x8xf32>
    %88 = vector.multi_reduction <add>, %87, %cst_24 [2] : vector<4x8x8xf32> to vector<4x8xf32>
    %89 = vector.shape_cast %88 : vector<4x8xf32> to vector<4x8x1xf32>
    %90 = vector.broadcast %89 : vector<4x8x1xf32> to vector<4x8x8xf32>
    %91 = arith.divf %87, %90 : vector<4x8x8xf32>
    %92 = arith.truncf %91 : vector<4x8x8xf32> to vector<4x8x8xbf16>
    "tpu.trace_start"() <{level = 10 : i32, message = "hlm,hmd->hld"}> : () -> ()
    %cst_25 = arith.constant dense<0.000000e+00> : vector<4x8x8xf32>
    %93 = tpu.matmul %92, %76, %cst_25 {dimension_numbers = #tpu.dot_dimension_numbers<[2], [1], [1], [2], [0, 0, 0, 1, 1, 2], [0], [0]>} : vector<4x8x8xbf16>, vector<4x8x8xbf16>, vector<4x8x8xf32> -> vector<4x8x8xf32>
    "tpu.trace_stop"() : () -> ()
    %94 = vector.extract_strided_slice %93 {offsets = [0, 0, 0], sizes = [1, 8, 8], strides = [1, 1, 1]} : vector<4x8x8xf32> to vector<1x8x8xf32>
    %95 = vector.shape_cast %94 : vector<1x8x8xf32> to vector<8x8xf32>
    %96 = vector.extract_strided_slice %93 {offsets = [1, 0, 0], sizes = [1, 8, 8], strides = [1, 1, 1]} : vector<4x8x8xf32> to vector<1x8x8xf32>
    %97 = vector.shape_cast %96 : vector<1x8x8xf32> to vector<8x8xf32>
    %98 = vector.extract_strided_slice %93 {offsets = [2, 0, 0], sizes = [1, 8, 8], strides = [1, 1, 1]} : vector<4x8x8xf32> to vector<1x8x8xf32>
    %99 = vector.shape_cast %98 : vector<1x8x8xf32> to vector<8x8xf32>
    %100 = vector.extract_strided_slice %93 {offsets = [3, 0, 0], sizes = [1, 8, 8], strides = [1, 1, 1]} : vector<4x8x8xf32> to vector<1x8x8xf32>
    %101 = vector.shape_cast %100 : vector<1x8x8xf32> to vector<8x8xf32>
    %102 = tpu.concatenate %95, %97, %99, %101 in 1 : vector<8x8xf32>, vector<8x8xf32>, vector<8x8xf32>, vector<8x8xf32> -> vector<8x32xf32>
    %103 = arith.truncf %102 : vector<8x32xf32> to vector<8x32xbf16>
    %c0_26 = arith.constant 0 : index
    %c0_27 = arith.constant 0 : index
    %c0_28 = arith.constant 0 : index
    %104 = vector.load %arg9[%c0_26, %c0_27, %c0_28] : memref<1x32x32xbf16, #tpu.memory_space<vmem>>, vector<1x32x32xbf16>
    %105 = vector.shape_cast %104 : vector<1x32x32xbf16> to vector<32x32xbf16>
    %cst_29 = arith.constant dense<0.000000e+00> : vector<8x32xf32>
    %106 = tpu.matmul %103, %105, %cst_29 {dimension_numbers = #tpu.dot_dimension_numbers<[1], [0], [0], [1], [0, 0, 1, 1], [], []>} : vector<8x32xbf16>, vector<32x32xbf16>, vector<8x32xf32> -> vector<8x32xf32>
    %c0_30 = arith.constant 0 : index
    %c0_31 = arith.constant 0 : index
    %c0_32 = arith.constant 0 : index
    %107 = vector.load %arg10[%c0_30, %c0_31, %c0_32] : memref<1x1x32xf32, #tpu.memory_space<vmem>>, vector<1x1x32xf32>
    %108 = vector.shape_cast %107 : vector<1x1x32xf32> to vector<1x32xf32>
    %109 = vector.broadcast %108 : vector<1x32xf32> to vector<8x32xf32>
    %110 = arith.addf %106, %109 : vector<8x32xf32>
    %111 = arith.addf %3, %110 : vector<8x32xf32>
    %c0_33 = arith.constant 0 : index
    %c0_34 = arith.constant 0 : index
    %c0_35 = arith.constant 0 : index
    %112 = vector.load %arg11[%c0_33, %c0_34, %c0_35] : memref<1x1x32xf32, #tpu.memory_space<vmem>>, vector<1x1x32xf32>
    %113 = vector.shape_cast %112 : vector<1x1x32xf32> to vector<1x32xf32>
    %c0_36 = arith.constant 0 : index
    %c0_37 = arith.constant 0 : index
    %c0_38 = arith.constant 0 : index
    %114 = vector.load %arg12[%c0_36, %c0_37, %c0_38] : memref<1x1x32xf32, #tpu.memory_space<vmem>>, vector<1x1x32xf32>
    %115 = vector.shape_cast %114 : vector<1x1x32xf32> to vector<1x32xf32>
    %cst_39 = arith.constant dense<0.000000e+00> : vector<8xf32>
    %116 = vector.multi_reduction <add>, %111, %cst_39 [1] : vector<8x32xf32> to vector<8xf32>
    %117 = vector.shape_cast %116 : vector<8xf32> to vector<8x1xf32>
    %cst_40 = arith.constant 3.200000e+01 : f32
    %118 = vector.broadcast %cst_40 : f32 to vector<8x1xf32>
    %119 = arith.divf %117, %118 : vector<8x1xf32>
    %120 = vector.broadcast %119 : vector<8x1xf32> to vector<8x32xf32>
    %121 = arith.subf %111, %120 : vector<8x32xf32>
    %122 = arith.mulf %121, %121 : vector<8x32xf32>
    %cst_41 = arith.constant dense<0.000000e+00> : vector<8xf32>
    %123 = vector.multi_reduction <add>, %122, %cst_41 [1] : vector<8x32xf32> to vector<8xf32>
    %124 = vector.shape_cast %123 : vector<8xf32> to vector<8x1xf32>
    %cst_42 = arith.constant 3.200000e+01 : f32
    %125 = vector.broadcast %cst_42 : f32 to vector<8x1xf32>
    %126 = arith.divf %124, %125 : vector<8x1xf32>
    %127 = vector.broadcast %119 : vector<8x1xf32> to vector<8x32xf32>
    %128 = arith.subf %111, %127 : vector<8x32xf32>
    %cst_43 = arith.constant 9.99999974E-6 : f32
    %129 = vector.broadcast %cst_43 : f32 to vector<8x1xf32>
    %130 = arith.addf %126, %129 : vector<8x1xf32>
    %131 = math.rsqrt %130 : vector<8x1xf32>
    %132 = vector.broadcast %131 : vector<8x1xf32> to vector<8x32xf32>
    %133 = arith.mulf %128, %132 : vector<8x32xf32>
    %134 = vector.broadcast %113 : vector<1x32xf32> to vector<8x32xf32>
    %135 = arith.mulf %133, %134 : vector<8x32xf32>
    %136 = vector.broadcast %115 : vector<1x32xf32> to vector<8x32xf32>
    %137 = arith.addf %135, %136 : vector<8x32xf32>
    %138 = arith.truncf %137 : vector<8x32xf32> to vector<8x32xbf16>
    %c0_44 = arith.constant 0 : index
    %c0_45 = arith.constant 0 : index
    %c0_46 = arith.constant 0 : index
    %139 = vector.load %arg13[%c0_44, %c0_45, %c0_46] : memref<1x32x128xbf16, #tpu.memory_space<vmem>>, vector<1x32x128xbf16>
    %140 = vector.shape_cast %139 : vector<1x32x128xbf16> to vector<32x128xbf16>
    %cst_47 = arith.constant dense<0.000000e+00> : vector<8x128xf32>
    %141 = tpu.matmul %138, %140, %cst_47 {dimension_numbers = #tpu.dot_dimension_numbers<[1], [0], [0], [1], [0, 0, 1, 1], [], []>} : vector<8x32xbf16>, vector<32x128xbf16>, vector<8x128xf32> -> vector<8x128xf32>
    %c0_48 = arith.constant 0 : index
    %c0_49 = arith.constant 0 : index
    %c0_50 = arith.constant 0 : index
    %142 = vector.load %arg14[%c0_48, %c0_49, %c0_50] : memref<1x1x128xf32, #tpu.memory_space<vmem>>, vector<1x1x128xf32>
    %143 = vector.shape_cast %142 : vector<1x1x128xf32> to vector<1x128xf32>
    %144 = vector.broadcast %143 : vector<1x128xf32> to vector<8x128xf32>
    %145 = arith.addf %141, %144 : vector<8x128xf32>
    %cst_51 = arith.constant 1.702000e+00 : f32
    %146 = vector.broadcast %cst_51 : f32 to vector<8x128xf32>
    %147 = arith.mulf %146, %145 : vector<8x128xf32>
    %148 = arith.negf %147 : vector<8x128xf32>
    %149 = math.exp %148 : vector<8x128xf32>
    %cst_52 = arith.constant 1.000000e+00 : f32
    %150 = vector.broadcast %cst_52 : f32 to vector<8x128xf32>
    %151 = arith.addf %150, %149 : vector<8x128xf32>
    %152 = arith.divf %150, %151 : vector<8x128xf32>
    %153 = arith.mulf %145, %152 : vector<8x128xf32>
    %154 = arith.truncf %153 : vector<8x128xf32> to vector<8x128xbf16>
    %c0_53 = arith.constant 0 : index
    %c0_54 = arith.constant 0 : index
    %c0_55 = arith.constant 0 : index
    %155 = vector.load %arg15[%c0_53, %c0_54, %c0_55] : memref<1x128x32xbf16, #tpu.memory_space<vmem>>, vector<1x128x32xbf16>
    %156 = vector.shape_cast %155 : vector<1x128x32xbf16> to vector<128x32xbf16>
    %cst_56 = arith.constant dense<0.000000e+00> : vector<8x32xf32>
    %157 = tpu.matmul %154, %156, %cst_56 {dimension_numbers = #tpu.dot_dimension_numbers<[1], [0], [0], [1], [0, 0, 1, 1], [], []>} : vector<8x128xbf16>, vector<128x32xbf16>, vector<8x32xf32> -> vector<8x32xf32>
    %c0_57 = arith.constant 0 : index
    %c0_58 = arith.constant 0 : index
    %c0_59 = arith.constant 0 : index
    %158 = vector.load %arg16[%c0_57, %c0_58, %c0_59] : memref<1x1x32xf32, #tpu.memory_space<vmem>>, vector<1x1x32xf32>
    %159 = vector.shape_cast %158 : vector<1x1x32xf32> to vector<1x32xf32>
    %160 = vector.broadcast %159 : vector<1x32xf32> to vector<8x32xf32>
    %161 = arith.addf %157, %160 : vector<8x32xf32>
    %162 = arith.addf %111, %161 : vector<8x32xf32>
    %c0_60 = arith.constant 0 : index
    %c0_61 = arith.constant 0 : index
    %163 = vector.load %arg21[%c0_60, %c0_61] : memref<8x32xf32, #tpu.memory_space<vmem>>, vector<8x32xf32>
    tpu.vector_store %arg21[%c0_60, %c0_61], %162 {strides = array<i32>} : memref<8x32xf32, #tpu.memory_space<vmem>>, vector<8x32xf32>,
    %c1_i32 = arith.constant 1 : i32
    %164 = arith.cmpi eq, %arg1, %c1_i32 : i32
    %165 = arith.extui %164 : i1 to i32
    %c0_i32_62 = arith.constant 0 : i32
    %166 = arith.cmpi ne, %165, %c0_i32_62 : i32
    scf.if %166 {
      %c1_i32_63 = arith.constant 1 : i32
      %167 = arith.muli %arg0, %c1_i32_63 : i32
      %c0_i32_64 = arith.constant 0 : i32
      %168 = arith.addi %167, %c0_i32_64 : i32
      %169 = arith.index_cast %168 : i32 to index
      %170 = memref.load %arg2[%169] : memref<2xi32, #tpu.memory_space<smem>>
      %c0_i32_65 = arith.constant 0 : i32
      %171 = arith.addi %c0_i32_65, %170 : i32
      %172 = arith.index_cast %171 : i32 to index
      %c0_66 = arith.constant 0 : index
      %173 = vector.load %arg21[%172, %c0_66] : memref<8x32xf32, #tpu.memory_space<vmem>>, vector<1x32xf32>
      %c0_67 = arith.constant 0 : index
      %c0_68 = arith.constant 0 : index
      %174 = vector.load %arg17[%c0_67, %c0_68] : memref<1x32xf32, #tpu.memory_space<vmem>>, vector<1x32xf32>
      %c0_69 = arith.constant 0 : index
      %c0_70 = arith.constant 0 : index
      %175 = vector.load %arg18[%c0_69, %c0_70] : memref<1x32xf32, #tpu.memory_space<vmem>>, vector<1x32xf32>
      %cst_71 = arith.constant dense<0.000000e+00> : vector<1xf32>
      %176 = vector.multi_reduction <add>, %173, %cst_71 [1] : vector<1x32xf32> to vector<1xf32>
      %177 = vector.shape_cast %176 : vector<1xf32> to vector<1x1xf32>
      %cst_72 = arith.constant 3.200000e+01 : f32
      %178 = vector.broadcast %cst_72 : f32 to vector<1x1xf32>
      %179 = arith.divf %177, %178 : vector<1x1xf32>
      %180 = vector.broadcast %179 : vector<1x1xf32> to vector<1x32xf32>
      %181 = arith.subf %173, %180 : vector<1x32xf32>
      %182 = arith.mulf %181, %181 : vector<1x32xf32>
      %cst_73 = arith.constant dense<0.000000e+00> : vector<1xf32>
      %183 = vector.multi_reduction <add>, %182, %cst_73 [1] : vector<1x32xf32> to vector<1xf32>
      %184 = vector.shape_cast %183 : vector<1xf32> to vector<1x1xf32>
      %cst_74 = arith.constant 3.200000e+01 : f32
      %185 = vector.broadcast %cst_74 : f32 to vector<1x1xf32>
      %186 = arith.divf %184, %185 : vector<1x1xf32>
      %187 = vector.broadcast %179 : vector<1x1xf32> to vector<1x32xf32>
      %188 = arith.subf %173, %187 : vector<1x32xf32>
      %cst_75 = arith.constant 9.99999974E-6 : f32
      %189 = vector.broadcast %cst_75 : f32 to vector<1x1xf32>
      %190 = arith.addf %186, %189 : vector<1x1xf32>
      %191 = math.rsqrt %190 : vector<1x1xf32>
      %192 = vector.broadcast %191 : vector<1x1xf32> to vector<1x32xf32>
      %193 = arith.mulf %188, %192 : vector<1x32xf32>
      %194 = arith.mulf %193, %174 : vector<1x32xf32>
      %195 = arith.addf %194, %175 : vector<1x32xf32>
      %196 = arith.truncf %195 : vector<1x32xf32> to vector<1x32xbf16>
      %c0_76 = arith.constant 0 : index
      %c0_77 = arith.constant 0 : index
      %197 = vector.load %arg19[%c0_76, %c0_77] : memref<32x128xbf16, #tpu.memory_space<vmem>>, vector<32x128xbf16>
      %cst_78 = arith.constant dense<0.000000e+00> : vector<1x128xf32>
      %198 = tpu.matmul %196, %197, %cst_78 {dimension_numbers = #tpu.dot_dimension_numbers<[1], [0], [0], [1], [0, 0, 1, 1], [], []>} : vector<1x32xbf16>, vector<32x128xbf16>, vector<1x128xf32> -> vector<1x128xf32>
      %c0_79 = arith.constant 0 : index
      %c0_80 = arith.constant 0 : index
      %c0_81 = arith.constant 0 : index
      %199 = vector.load %arg20[%c0_79, %c0_80, %c0_81] : memref<1x1x128xf32, #tpu.memory_space<vmem>>, vector<1x1x128xf32>
      %200 = vector.shape_cast %199 : vector<1x1x128xf32> to vector<1x128xf32>
      %201 = vector.shape_cast %198 : vector<1x128xf32> to vector<1x1x128xf32>
      tpu.vector_store %arg20[%c0_79, %c0_80, %c0_81], %201 {strides = array<i32>} : memref<1x1x128xf32, #tpu.memory_space<vmem>>, vector<1x1x128xf32>,
    } else {
    }
    return
  }
  func.func @transform_0(%arg0: i32, %arg1: i32, %arg2: memref<2xi32, #tpu.memory_space<smem>>) -> (i32, i32, i32) {
    %c0_i32 = arith.constant 0 : i32
    %c0_i32_0 = arith.constant 0 : i32
    %c0_i32_1 = arith.constant 0 : i32
    return %arg0, %c0_i32, %c0_i32_0 : i32, i32, i32
  }
  func.func @transform_1(%arg0: i32, %arg1: i32, %arg2: memref<2xi32, #tpu.memory_space<smem>>) -> (i32, i32) {
    %c0_i32 = arith.constant 0 : i32
    %c0_i32_0 = arith.constant 0 : i32
    %c0_i32_1 = arith.constant 0 : i32
    return %c0_i32, %c0_i32_0 : i32, i32
  }
  func.func @transform_2(%arg0: i32, %arg1: i32, %arg2: memref<2xi32, #tpu.memory_space<smem>>) -> (i32, i32, i32) {
    %c0_i32 = arith.constant 0 : i32
    %c0_i32_0 = arith.constant 0 : i32
    %c0_i32_1 = arith.constant 0 : i32
    return %arg1, %c0_i32, %c0_i32_0 : i32, i32, i32
  }
  func.func @transform_3(%arg0: i32, %arg1: i32, %arg2: memref<2xi32, #tpu.memory_space<smem>>) -> (i32, i32, i32) {
    %c0_i32 = arith.constant 0 : i32
    %c0_i32_0 = arith.constant 0 : i32
    %c0_i32_1 = arith.constant 0 : i32
    return %arg1, %c0_i32, %c0_i32_0 : i32, i32, i32
  }
  func.func @transform_4(%arg0: i32, %arg1: i32, %arg2: memref<2xi32, #tpu.memory_space<smem>>) -> (i32, i32, i32) {
    %c0_i32 = arith.constant 0 : i32
    %c0_i32_0 = arith.constant 0 : i32
    %c0_i32_1 = arith.constant 0 : i32
    return %arg1, %c0_i32, %c0_i32_0 : i32, i32, i32
  }
  func.func @transform_5(%arg0: i32, %arg1: i32, %arg2: memref<2xi32, #tpu.memory_space<smem>>) -> (i32, i32, i32) {
    %c0_i32 = arith.constant 0 : i32
    %c0_i32_0 = arith.constant 0 : i32
    %c0_i32_1 = arith.constant 0 : i32
    return %arg1, %c0_i32, %c0_i32_0 : i32, i32, i32
  }
  func.func @transform_6(%arg0: i32, %arg1: i32, %arg2: memref<2xi32, #tpu.memory_space<smem>>) -> (i32, i32, i32) {
    %c0_i32 = arith.constant 0 : i32
    %c0_i32_0 = arith.constant 0 : i32
    %c0_i32_1 = arith.constant 0 : i32
    return %arg1, %c0_i32, %c0_i32_0 : i32, i32, i32
  }
  func.func @transform_7(%arg0: i32, %arg1: i32, %arg2: memref<2xi32, #tpu.memory_space<smem>>) -> (i32, i32, i32) {
    %c0_i32 = arith.constant 0 : i32
    %c0_i32_0 = arith.constant 0 : i32
    %c0_i32_1 = arith.constant 0 : i32
    return %arg1, %c0_i32, %c0_i32_0 : i32, i32, i32
  }
  func.func @transform_8(%arg0: i32, %arg1: i32, %arg2: memref<2xi32, #tpu.memory_space<smem>>) -> (i32, i32, i32) {
    %c0_i32 = arith.constant 0 : i32
    %c0_i32_0 = arith.constant 0 : i32
    %c0_i32_1 = arith.constant 0 : i32
    return %arg1, %c0_i32, %c0_i32_0 : i32, i32, i32
  }
  func.func @transform_9(%arg0: i32, %arg1: i32, %arg2: memref<2xi32, #tpu.memory_space<smem>>) -> (i32, i32, i32) {
    %c0_i32 = arith.constant 0 : i32
    %c0_i32_0 = arith.constant 0 : i32
    %c0_i32_1 = arith.constant 0 : i32
    return %arg1, %c0_i32, %c0_i32_0 : i32, i32, i32
  }
  func.func @transform_10(%arg0: i32, %arg1: i32, %arg2: memref<2xi32, #tpu.memory_space<smem>>) -> (i32, i32, i32) {
    %c0_i32 = arith.constant 0 : i32
    %c0_i32_0 = arith.constant 0 : i32
    %c0_i32_1 = arith.constant 0 : i32
    return %arg1, %c0_i32, %c0_i32_0 : i32, i32, i32
  }
  func.func @transform_11(%arg0: i32, %arg1: i32, %arg2: memref<2xi32, #tpu.memory_space<smem>>) -> (i32, i32, i32) {
    %c0_i32 = arith.constant 0 : i32
    %c0_i32_0 = arith.constant 0 : i32
    %c0_i32_1 = arith.constant 0 : i32
    return %arg1, %c0_i32, %c0_i32_0 : i32, i32, i32
  }
  func.func @transform_12(%arg0: i32, %arg1: i32, %arg2: memref<2xi32, #tpu.memory_space<smem>>) -> (i32, i32, i32) {
    %c0_i32 = arith.constant 0 : i32
    %c0_i32_0 = arith.constant 0 : i32
    %c0_i32_1 = arith.constant 0 : i32
    return %arg1, %c0_i32, %c0_i32_0 : i32, i32, i32
  }
  func.func @transform_13(%arg0: i32, %arg1: i32, %arg2: memref<2xi32, #tpu.memory_space<smem>>) -> (i32, i32, i32) {
    %c0_i32 = arith.constant 0 : i32
    %c0_i32_0 = arith.constant 0 : i32
    %c0_i32_1 = arith.constant 0 : i32
    return %arg1, %c0_i32, %c0_i32_0 : i32, i32, i32
  }
  func.func @transform_14(%arg0: i32, %arg1: i32, %arg2: memref<2xi32, #tpu.memory_space<smem>>) -> (i32, i32) {
    %c0_i32 = arith.constant 0 : i32
    %c0_i32_0 = arith.constant 0 : i32
    %c0_i32_1 = arith.constant 0 : i32
    return %c0_i32, %c0_i32_0 : i32, i32
  }
  func.func @transform_15(%arg0: i32, %arg1: i32, %arg2: memref<2xi32, #tpu.memory_space<smem>>) -> (i32, i32) {
    %c0_i32 = arith.constant 0 : i32
    %c0_i32_0 = arith.constant 0 : i32
    %c0_i32_1 = arith.constant 0 : i32
    return %c0_i32, %c0_i32_0 : i32, i32
  }
  func.func @transform_16(%arg0: i32, %arg1: i32, %arg2: memref<2xi32, #tpu.memory_space<smem>>) -> (i32, i32) {
    %c0_i32 = arith.constant 0 : i32
    %c0_i32_0 = arith.constant 0 : i32
    %c0_i32_1 = arith.constant 0 : i32
    return %c0_i32, %c0_i32_0 : i32, i32
  }
  func.func @transform_17(%arg0: i32, %arg1: i32, %arg2: memref<2xi32, #tpu.memory_space<smem>>) -> (i32, i32, i32) {
    %c0_i32 = arith.constant 0 : i32
    %c0_i32_0 = arith.constant 0 : i32
    %c0_i32_1 = arith.constant 0 : i32
    return %arg0, %c0_i32, %c0_i32_0 : i32, i32, i32
  }
}

</mosaic_0001>

<bundles_post_ra>
// kernel: tpu_custom_call.1
= control target key start
LH: loop header
LB: loop body
LE: loop exit
PB: predicated region body
PF: predicated region fallthrough
CT: control target
= control target key end

     0   :  { %s1994_s30 = smov [#allocation4]   ;;  %s2438_s0 = inlined_call_operand.vmem [shape: s32[2], index: 0, kind: input, shape index: {}]   ;;  %s2439_s1 = inlined_call_operand.vmem [shape: f32[2,8,32], index: 1, kind: input, shape index: {}]   ;;  %s2440_s2 = inlined_call_operand.vmem [shape: f32[8,32], index: 2, kind: input, shape index: {}]   ;;  %s2441_s3 = inlined_call_operand.vmem [shape: f32[2,1,32], index: 3, kind: input, shape index: {}]   ;;  %s2442_s4 = inlined_call_operand.vmem [shape: f32[2,1,32], index: 4, kind: input, shape index: {}]   ;;  %s2443_s5 = inlined_call_operand.vmem [shape: bf16[2,32,96], index: 5, kind: input, shape index: {}]   ;;  %s2444_s6 = inlined_call_operand.vmem [shape: f32[2,1,96], index: 6, kind: input, shape index: {}]   ;;  %s2445_s7 = inlined_call_operand.vmem [shape: bf16[2,32,32], index: 7, kind: input, shape index: {}]   ;;  %s2446_s8 = inlined_call_operand.vmem [shape: f32[2,1,32], index: 8, kind: input, shape index: {}]   ;;  %s2447_s9 = inlined_call_operand.vmem [shape: f32[2,1,32], index: 9, kind: input, shape index: {}]   ;;  %s2448_s10 = inlined_call_operand.vmem [shape: f32[2,1,32], index: 10, kind: input, shape index: {}]   ;;  %s2449_s11 = inlined_call_operand.vmem [shape: bf16[2,32,128], index: 11, kind: input, shape index: {}]   ;;  %s2450_s12 = inlined_call_operand.vmem [shape: f32[2,1,128], index: 12, kind: input, shape index: {}]   ;;  %s2451_s13 = inlined_call_operand.vmem [shape: bf16[2,128,32], index: 13, kind: input, shape index: {}]   ;;  %s2452_s14 = inlined_call_operand.vmem [shape: f32[2,1,32], index: 14, kind: input, shape index: {}]   ;;  %s2453_s15 = inlined_call_operand.vmem [shape: f32[1,32], index: 15, kind: input, shape index: {}]   ;;  %s2454_s16 = inlined_call_operand.vmem [shape: f32[1,32], index: 16, kind: input, shape index: {}]   ;;  %s2455_s17 = inlined_call_operand.vmem [shape: bf16[32,128], index: 17, kind: input, shape index: {}]   ;;  %s2456_s18 = inlined_call_operand.hbm [shape: f32[2,1,128], index: 18, kind: output, shape index: {}]  }
   0x1   :  { %2471 = sst [smem:[#allocation21_spill]] %s2438_s0 }
   0x2   :  { %2472 = sst [smem:[#allocation22_spill]] %s2439_s1 }
   0x3   :  { %2473 = sst [smem:[#allocation23_spill]] %s2440_s2 }
   0x4   :  { %2474 = sst [smem:[#allocation24_spill]] %s2442_s4 }
   0x5   :  { %2475 = sst [smem:[#allocation25_spill]] %s2443_s5 }
   0x6   :  { %2476 = sst [smem:[#allocation26_spill]] %s2445_s7 }
   0x7   :  { %2477 = sst [smem:[#allocation27_spill]] %s2450_s12 }
   0x8   :  { %2478 = sst [smem:[#allocation28_spill]] %s2453_s15 }
   0x9   :  { %2479 = sst [smem:[#allocation29_spill]] %s2454_s16 }
   0xa   :  { %2480 = sst [smem:[#allocation30_spill]] %s2455_s17 }
   0xb   :  { %2481 = sst [smem:[#allocation31_spill]] %s2456_s18 }
   0xc   :  { %s2482_s29 = sld [smem:[#allocation21_spill]] }
  0x12   :  { %s24_s12 = sshll.u32 %s2482_s29, 4  ;;  %s25_s12 = int_to_ptr.vmem [resolvable:$true] %s24_s12 }
  0x13   :  { %27 = dma.vmem_to_smem %s25_s12, 16, %s1994_s30, [#allocation3] }
  0x14   :  { %1956 = dma.done.wait [#allocation3], 16 }
  0x15   :  { %1957 = vsyncadd [#allocation3], 4294967280 }
  0x16   :  { %30 = sfence }
  0x17   :  { %31 = vsyncpa [#allocation6], 0 }
  0x18   :  { %33 = vsyncpa [#allocation6 + $0x1], 0  ;;  %s2103_s0 = smov 0   ;;  %s2105_s19 = smov 0  }
  0x19   :  { %s2107_s1 = smov 0   ;;  %s2109_s20 = smov 0  }
  0x1a   :  { %s2111_s21 = smov 0   ;;  %s2113_s22 = smov 0  }
  0x1b   :  { %s2115_s2 = smov 0   ;;  %s2117_s12 = smov 0  }
  0x1c LB: > { %2483 = sst [smem:[#allocation9_spill]] %s1964_s0  ;;  %s1651_s23 = sadd.s32 4294967295, %s1992_s12   ;;  %s1992_s12 = sphi %s2117_s12, %s39_s12   ;;  %s1988_s2 = sphi %s2115_s2, %s2529_s2   ;;  %s1984_s22 = sphi %s2113_s22, %s2528_s22   ;;  %s1980_s21 = sphi %s2111_s21, %s2527_s21   ;;  %s1976_s20 = sphi %s2109_s20, %s2526_s20   ;;  %s1972_s1 = sphi %s2107_s1, %s2525_s1   ;;  %s1968_s19 = sphi %s2105_s19, %s2531_s19   ;;  %s1964_s0 = sphi %s2103_s0, %s2530_s0  }
  0x1d   : > { %2484 = sst [smem:[#allocation10_spill]] %s1972_s1  ;;  %s1652_s24 = sadd.s32 4294967294, %s1992_s12  }
  0x1e   : > { %2485 = sst [smem:[#allocation11_spill]] %s1980_s21  ;;  %s48_s25 = sadd.s32 1, %s1984_s22 }
  0x1f   : > { %2486 = sst [smem:[#allocation12_spill]] %s1984_s22  ;;  %p49_p0 = scmp.ge.s32.totalorder %s48_s25, 2 }
  0x20   : > { %2487 = sst [smem:[#allocation13_spill]] %s1988_s2  ;;  %s51_s26 = sadd.s32 1, %s1988_s2 }
  0x21   : > { %2488 = sst [smem:[#allocation14_spill]] %s1992_s12  ;;  %p490_p1 = scmp.ne.s32.totalorder %s1972_s1, %s1968_s19 }
  0x22   : > { %p491_p2 = scmp.eq.s32.totalorder %s1651_s23, 3  ;;  %s2533_s25 = smov (%p49_p0, %s48_s25), 0 }
  0x23   : > { %2489 = sst [smem:[#allocation15_spill]] %s2533_s25  ;;  %s2535_s26 = smov (!%p49_p0, %s51_s26), %s1988_s2 }
  0x24   : > { %p2152_p3 = por %p491_p2, %p490_p1  ;;  %p496_p4 = scmp.ne.s32.totalorder %s1968_s19, %s1964_s0 }
  0x25   : > { %p53_p5 = scmp.ge.s32.totalorder %s2535_s26, 2  ;;  %p497_p6 = scmp.eq.s32.totalorder %s1652_s24, 3 }
  0x26   : > { %s2490_s27 = scalar_select %p2152_p3, 1, 0 }
  0x27   : > { %p1655_p7 = scmp.ge.s32.totalorder %s1992_s12, 1  ;;  %p614_p8 = scmp.lt.s32.totalorder %s1992_s12, 5 }
  0x28   : > { %2491 = sst [smem:[#allocation16_spill]] %s2490_s27  ;;  %s2537_s26 = smov (%p53_p5, %s2535_s26), 0 }
  0x29   : > { %2492 = sst [smem:[#allocation17_spill]] %s2537_s26  ;;  %p2162_p9 = por %p497_p6, %p496_p4 }
  0x2a   : > { %p615_p10 = pnand %p1655_p7, %p614_p8  ;;  %s477_s29 = ssub.s32 %s1988_s2, %s2537_s26 }
  0x2b   : > { %s2493_s28 = scalar_select %p2162_p9, 1, 0 }
  0x2c   : > { %s480_s30 = sadd.s32 1, %s1972_s1  ;;  %p478_p11 = scmp.eq.s32.totalorder %s477_s29, 0 }
  0x2d   : > { %2494 = sst [smem:[#allocation18_spill]] %s2493_s28  ;;  %618 = sbr.rel (%p615_p10) target bundleno = 2497 (0x9c1), region = 88 }
  0x2e   : > { %s2170_s23 = scalar_select %p478_p11, %s1972_s1, %s480_s30  }
  0x30   : > { %2495 = sst [smem:[#allocation19_spill]] %s2170_s23 }
  0x32   : > { %p708_p12 = scmp.lt.s32.totalorder %s1980_s21, 1  ;;  %p712_p13 = scmp.lt.s32.totalorder %s1976_s20, 1 }
  0x33   : > { %s2496_s2 = sld [smem:[#allocation22_spill]]  ;;  %s2502_s15 = sand.u32 1, %s1968_s19  }
  0x34   : > { %s709_s25 = scalar_select %p708_p12, %s1980_s21, 1 }
  0x35   : > { %s2177_s22 = scalar_select %p712_p13, %s1976_s20, 1 }
  0x36   : > { %s1656_s29 = sshll.u32 %s709_s25, 3  ;;  %s2498_s5 = sld [smem:[#allocation25_spill]] }
  0x37   : > { %s1746_s18 = sshll.u32 %s2177_s22, 4  ;;  %s2499_s7 = sld [smem:[#allocation26_spill]] }
  0x38   : > { %s2220_s25 = scalar_lea.vmem %s2449_s11, %s1746_s18  ;;  %s2501_s26 = sld [smem:[#allocation27_spill]] }
  0x39   : > { %s711_s24 = scalar_lea.vmem %s2496_s2, %s1656_s29  ;;  %s755_s0 = scalar_lea.vmem %s2452_s14, %s2177_s22 }
  0x3a   : > { %s2238_s16 = scalar_lea.vmem [#allocation5], %s2502_s15  ;;  %p1665_p0 = scmp.ne.s32.totalorder %s1976_s20, 0 }
  0x3c   : > { %s2194_s17 = scalar_lea.vmem %s2498_s5, %s1746_s18  ;;  %s739_s5 = scalar_lea.vmem %s2448_s10, %s2177_s22 }
  0x3d   : > { %s2203_s29 = scalar_lea.vmem %s2499_s7, %s1746_s18  ;;  %760 = sbr.rel (%p1665_p0) target bundleno = 73 (0x49), region = 92 }
  0x3e   : > { %2500 = sst [smem:[#allocation20_spill]] %s2203_s29  ;;  %s747_s7 = scalar_lea.vmem %s2501_s26, %s2177_s22 }
  0x3f   : > { %s1749_s29 = sshll.u32 %s2177_s22, 6  ;;  %s2503_s26 = sld [smem:[#allocation23_spill]] (!%p1665_p0) }
  0x40   : > { %s2234_s28 = scalar_lea.vmem %s2451_s13, %s1749_s29 }
  0x42   : > { %v761_v0 = vld [vmem:[%s711_s24] sm:$0xff]  ;;  %vm764_vm0 = vcmask 261120  }
  0x45   : > { %v762_v1 = vld [vmem:[%s2503_s26] sm:$0xff] }
  0x46   : > { %v763_v2 = vadd.f32 %v762_v1, %v761_v0 }
  0x48   : > { %765 = vst.msk [vmem:[#allocation2] sm:$0xff] %vm764_vm0, %v763_v2 }
  0x49 PF: > { %vm775_vm1 = vcmask 261120   ;;  %v1995_v5 = vmov 32.0   ;;  %v1751_v17 = vld [vmem:[%s2194_s17 + $0x8] sm:$0xff]  ;;  %v1750_v18 = vld [vmem:[%s2194_s17] sm:$0xff]  ;;  %s2504_s17 = scalar_lea.vmem %s2441_s3, %s2177_s22  ;;  %s2505_s2 = sld [smem:[#allocation24_spill]]  ;;  %vm869_vm6 = vcmask 64512   ;;  %v767_v62 = vlaneseq }
  0x4a   : > { %1856 = vrcp.f32 %v1995_v5  ;;  %843 = vmatpush.bf16.msra.mxu0 %v1751_v17  ;;  %v1848_v28 = vld [vmem:[%s2504_s17] ss:$0 sm:$0xff]  ;;  %s2507_s12 = scalar_lea.vmem %s2444_s6, %s2177_s22  ;;  %s1996_s15 = smov 104   ;;  %v2000_v2 = vmov -1e+09   ;;  %vm1074_vm8 = vcmask 1043456  }
  0x4b   : > { %v1850_v35 = vld [vmem:[%s2507_s12] ss:$0 sm:$0xff]  ;;  %s1997_s4 = smov 120   ;;  %s1998_s18 = smov 112   ;;  %v768_v63 = vshrl.u32 %v767_v62, 7  ;;  %v770_v0 = vand.u32 127, %v767_v62 }
  0x4c   : > { %s1999_s26 = smov 96   ;;  %s2001_s24 = smov 64  }
  0x4d   : > { %vm771_vm7 = vcmp.le.s32.totalorder %v770_v0, %v768_v63  ;;  %s2508_s29 = sld [smem:[#allocation20_spill]]  ;;  %s2002_s17 = smov 8  }
  0x4e   : > { %844 = vmatpush.bf16.msra.mxu0 %v1750_v18  ;;  %s2003_s21 = smov 24   ;;  %s2004_s30 = smov 16  }
  0x4f   : > { %v2244_v3 = vld [vmem:[#allocation2] sm:$0xff]  ;;  %s2506_s1 = scalar_lea.vmem %s2505_s2, %s2177_s22  ;;  %s2509_s23 = scalar_lea.vmem %s2446_s8, %s2177_s22 }
  0x50   : > { %v776_v4 = vsel %vm775_vm1, %v2244_v3, 0.0  ;;  %v1857_v6 = vpop.eup %1856  ;;  %v1849_v31 = vld [vmem:[%s2506_s1] ss:$0 sm:$0xff]  ;;  %s2510_s12 = scalar_lea.vmem %s2447_s9, %s2177_s22  ;;  %p1734_p1 = scmp.ne.s32.totalorder %s1976_s20, 1 }
  0x51   : > { %777 = vadd.xlane.f32.xlu0 %v776_v4  ;;  %v780_v7 = vmul.f32 32.0, %v1857_v6  ;;  %vm784_vm2 = vweird.f32 %v1857_v6  ;;  %v772_v4 = vsel %vm771_vm7, 0.0, %v2000_v2  ;;  %s2515_s27 = sld [smem:[#allocation28_spill]] (!%p1734_p1) }
  0x53   : > { %v781_v8 = vsub.f32 1.0, %v780_v7 }
  0x55   : > { %v782_v9 = vmul.f32 %v1857_v6, %v781_v8 }
  0x57   : > { %v783_v10 = vadd.f32 %v1857_v6, %v782_v9 }
  0x59   : > { %v2248_v11 = vsel %vm784_vm2, %v1857_v6, %v783_v10 }
  0xc4   : > { %v778_v12 = vpop.xlane.xlu0 %777 }
  0xc5   : > { %v786_v13 = vmul.f32 %v2248_v11, %v778_v12 }
  0xc7   : > { %v787_v14 = vsub.f32 %v2244_v3, %v786_v13 }
  0xc9   : > { %v788_v15 = vmul.f32 %v787_v14, %v787_v14 }
  0xcb   : > { %v789_v16 = vsel %vm775_vm1, %v788_v15, 0.0 }
  0xcc   : > { %790 = vadd.xlane.f32.xlu0 %v789_v16 }
 0x13f   : > { %v791_v19 = vpop.xlane.xlu0 %790 }
 0x140   : > { %v792_v20 = vmul.f32 %v791_v19, %v2248_v11 }
 0x142   : > { %v793_v21 = vadd.f32 1e-05, %v792_v20 }
 0x144   : > { %1858 = vrsqrt.f32 %v793_v21  ;;  %vm800_vm4 = vweird.f32 %v793_v21 }
 0x14a   : > { %v1859_v22 = vpop.eup %1858 }
 0x14b   : > { %v795_v23 = vmul.f32 %v1859_v22, %v793_v21  ;;  %vm801_vm3 = vweird.f32 %v1859_v22 }
 0x14c   : > { %vm802_vm5 = vmor %vm800_vm4, %vm801_vm3 }
 0x14d   : > { %v796_v24 = vmul.f32 %v1859_v22, %v795_v23 }
 0x14f   : > { %v797_v25 = vmul.f32 0.5, %v796_v24 }
 0x151   : > { %v798_v26 = vsub.f32 1.5, %v797_v25 }
 0x153   : > { %v799_v27 = vmul.f32 %v1859_v22, %v798_v26 }
 0x155   : > { %v803_v29 = vsel %vm802_vm5, %v1859_v22, %v799_v27 }
 0x156   : > { %v804_v30 = vmul.f32 %v803_v29, %v787_v14 }
 0x158   : > { %v808_v32 = vmul.f32 %v1848_v28, %v804_v30 }
 0x15a   : > { %v812_v33 = vadd.f32 %v1849_v31, %v808_v32 }
 0x15c   : > { %v813_v34 = vpack.c.bf16 %v812_v33, %v812_v33 }
 0x15e   : > { %1674 = vmatmul.msk.bf16.vlgmr.msra.gmra.mxu0 %vm775_vm1, %v813_v34 }
 0x1db   : > { %v846_v36 = vpop.f32.mrf.mxu0 }
 0x1dc   : > { %v847_v37 = vadd.f32 %v1850_v35, %v846_v36 }
 0x1de   : > { %857 = vrot.lane.b32.xlu2 %v847_v37, %s1996_s15  ;;  %851 = vrot.lane.b32.xlu1 %v847_v37, %s1997_s4  ;;  %v860_v47 = vpack.c.bf16 %v847_v37, %v847_v37  ;;  %s2516_s15 = sld [smem:[#allocation29_spill]] (!%p1734_p1) }
 0x1e0   : > { %v865_v50 = vunpack.c.l.b16 %v860_v47 }
 0x1e2   : > { %v2277_v53 = vpack.c.b16 %v865_v50, %v865_v50 }
 0x1e3   : > { %v848_v38 = vpop.f32.mrf.mxu0 }
 0x1e6   : > { %854 = vrot.lane.b32.xlu1 %v847_v37, %s1998_s18 }
 0x238   : > { %v858_v39 = vpop.permute.xlu2 %857 }
 0x239   : > { %v863_v40 = vpack.c.bf16 %v858_v39, %v858_v39 }
 0x23b   : > { %v938_v41 = vunpack.c.l.b16 %v863_v40 }
 0x23d   : > { %v2272_v42 = vpack.c.b16 %v938_v41, %v938_v41 }
 0x23f   : > { %940 = vrot.lane.b32.xlu1 %v2272_v42, %s1999_s26 }
 0x250   : > { %v852_v43 = vpop.permute.xlu1 %851 }
 0x251   : > { %v861_v44 = vpack.c.bf16 %v852_v43, %v852_v43 }
 0x253   : > { %v890_v45 = vunpack.c.l.b16 %v861_v44 }
 0x255   : > { %v891_v46 = vpack.c.b16 %v890_v45, %v890_v45 }
 0x257   : > { %892 = vrot.lane.b32.xlu2 %v891_v46, %s1999_s26 }
 0x258   : > { %v855_v48 = vpop.permute.xlu1 %854 }
 0x259   : > { %v862_v49 = vpack.c.bf16 %v855_v48, %v855_v48 }
 0x25b   : > { %v914_v51 = vunpack.c.l.b16 %v862_v49 }
 0x25d   : > { %v2275_v52 = vpack.c.b16 %v914_v51, %v914_v51 }
 0x25f   : > { %916 = vrot.lane.b32.xlu0 %v2275_v52, %s1999_s26  ;;  %867 = vrot.lane.b32.xlu2 %v2277_v53, %s1999_s26 }
 0x2b1   : > { %v893_v54 = vpop.permute.xlu2 %892  ;;  %v941_v55 = vpop.permute.xlu1 %940 }
 0x2b2   : > { %v898_v56 = vsel %vm869_vm6, %v893_v54, 0  ;;  %v946_v57 = vsel %vm869_vm6, %v941_v55, 0 }
 0x2b3   : > { %907 = vmatpush.bf16.xpose.msra.mxu2 %v898_v56  ;;  %955 = vmatpush.bf16.xpose.msrb.mxu0 %v946_v57 }
 0x2b9   : > { %v868_v58 = vpop.permute.xlu2 %867 }
 0x2ba   : > { %1676 = vmatmul.msk.bf16.vlgmr.msra.gmra.mxu2 %vm869_vm6, %v861_v44  ;;  %1678 = vmatmul.msk.bf16.vlgmr.msrb.gmra.mxu0 %vm869_vm6, %v863_v40  ;;  %v874_v59 = vsel %vm869_vm6, %v868_v58, 0 }
 0x2bb   : > { %883 = vmatpush.bf16.xpose.msra.mxu1 %v874_v59 }
 0x2c2   : > { %1675 = vmatmul.msk.bf16.vlgmr.msra.gmra.mxu1 %vm869_vm6, %v860_v47 }
 0x2d1   : > { %v917_v60 = vpop.permute.xlu0 %916 }
 0x2d2   : > { %v922_v61 = vsel %vm869_vm6, %v917_v60, 0 }
 0x2d3   : > { %931 = vmatpush.bf16.xpose.msra.mxu3 %v922_v61 }
 0x2da   : > { %1677 = vmatmul.msk.bf16.vlgmr.msra.gmra.mxu3 %vm869_vm6, %v862_v49 }
 0x337   : > { %v957_v1 = vpop.f32.mrf.mxu0 }
 0x338   : > { %v964_v5 = vmul.f32 0.35355338, %v957_v1 }
 0x33a   : > { %v968_v6 = vadd.f32 %v964_v5, %v772_v4 }
 0x33c   : > { %v978_v7 = vsel %vm869_vm6, %v968_v6, -inf }
 0x33d   : > { %v909_v8 = vpop.f32.mrf.mxu2  ;;  %979 = vmax.xlane.f32.xlu0 %v978_v7 }
 0x33e   : > { %v962_v9 = vmul.f32 0.35355338, %v909_v8 }
 0x33f   : > { %v885_v10 = vpop.f32.mrf.mxu1  ;;  %v959_v12 = vpop.f32.mrf.mxu0 }
 0x340   : > { %v966_v13 = vadd.f32 %v962_v9, %v772_v4  ;;  %v961_v20 = vmul.f32 0.35355338, %v885_v10 }
 0x342   : > { %v972_v14 = vsel %vm869_vm6, %v966_v13, -inf  ;;  %v965_v23 = vadd.f32 %v961_v20, %v772_v4 }
 0x343   : > { %973 = vmax.xlane.f32.xlu1 %v972_v14 }
 0x344   : > { %v969_v24 = vsel %vm869_vm6, %v965_v23, -inf }
 0x345   : > { %v911_v15 = vpop.f32.mrf.mxu2 }
 0x347   : > { %v887_v16 = vpop.f32.mrf.mxu1 }
 0x351   : > { %1091 = vrot.lane.b32.xlu0 %v891_v46, %s2001_s24 }
 0x35d   : > { %v933_v17 = vpop.f32.mrf.mxu3 }
 0x35e   : > { %v963_v18 = vmul.f32 0.35355338, %v933_v17 }
 0x360   : > { %v967_v19 = vadd.f32 %v963_v18, %v772_v4 }
 0x362   : > { %v975_v21 = vsel %vm869_vm6, %v967_v19, -inf }
 0x363   : > { %976 = vmax.xlane.f32.xlu2 %v975_v21 }
 0x365   : > { %v935_v22 = vpop.f32.mrf.mxu3 }
 0x36b   : > { %970 = vmax.xlane.f32.xlu2 %v969_v24 }
 0x3b0   : > { %v980_v25 = vpop.xlane.xlu0 %979 }
 0x3b1   : > { %v984_v26 = vsub.f32 %v968_v6, %v980_v25 }
 0x3b3   : > { %v991_v27 = vmul.f32 1.442695, %v984_v26 }
 0x3b5   : > { %1860 = vpow2.f32 %v991_v27 }
 0x3b6   : > { %v974_v28 = vpop.xlane.xlu1 %973 }
 0x3b7   : > { %v982_v29 = vsub.f32 %v966_v13, %v974_v28 }
 0x3b9   : > { %v987_v30 = vmul.f32 1.442695, %v982_v29 }
 0x3bb   : > { %v2294_v31 = vpop.eup %1860  ;;  %1862 = vpow2.f32 %v987_v30 }
 0x3bc   : > { %v1002_v32 = vsel %vm869_vm6, %v2294_v31, 0.0 }
 0x3bd   : > { %1003 = vadd.xlane.f32.xlu1 %v1002_v32 }
 0x3c1   : > { %v1863_v33 = vpop.eup %1862 }
 0x3c2   : > { %v996_v36 = vsel %vm869_vm6, %v1863_v33, 0.0 }
 0x3c3   : > { %v1092_v34 = vpop.permute.xlu0 %1091 }
 0x3c4   : > { %v1097_v35 = vsel %vm1074_vm8, %v1092_v34, 0 }
 0x3c5   : > { %1106 = vmatpush.bf16.msrb.mxu2 %v1097_v35  ;;  %997 = vadd.xlane.f32.xlu1 %v996_v36 }
 0x3d6   : > { %v977_v37 = vpop.xlane.xlu2 %976 }
 0x3d7   : > { %v983_v38 = vsub.f32 %v967_v19, %v977_v37 }
 0x3d9   : > { %v989_v39 = vmul.f32 1.442695, %v983_v38 }
 0x3db   : > { %1864 = vpow2.f32 %v989_v39 }
 0x3de   : > { %1133 = vrot.lane.b32.xlu1 %v2272_v42, %s2001_s24  ;;  %v971_v40 = vpop.xlane.xlu2 %970 }
 0x3df   : > { %v981_v41 = vsub.f32 %v965_v23, %v971_v40 }
 0x3e1   : > { %v2302_v43 = vpop.eup %1864  ;;  %v985_v44 = vmul.f32 1.442695, %v981_v41 }
 0x3e2   : > { %v999_v45 = vsel %vm869_vm6, %v2302_v43, 0.0 }
 0x3e3   : > { %1866 = vpow2.f32 %v985_v44  ;;  %1000 = vadd.xlane.f32.xlu2 %v999_v45 }
 0x3e9   : > { %v2306_v46 = vpop.eup %1866 }
 0x3ea   : > { %v993_v47 = vsel %vm869_vm6, %v2306_v46, 0.0 }
 0x3eb   : > { %994 = vadd.xlane.f32.xlu0 %v993_v47 }
 0x3fb   : > { %1112 = vrot.lane.b32.xlu2 %v2275_v52, %s2001_s24 }
 0x403   : > { %1069 = vrot.lane.b32.xlu2 %v2277_v53, %s2001_s24  ;;  %s2512_s24 = sld [smem:[#allocation11_spill]] (!%p1734_p1) }
 0x430   : > { %v1004_v42 = vpop.xlane.xlu1 %1003 }
 0x431   : > { %1868 = vrcp.f32 %v1004_v42  ;;  %v1061_v52 = vand.u32 2147483648, %v1004_v42  ;;  %vm1055_vm12 = vweird.f32 %v1004_v42  ;;  %v1059_v53 = vand.u32 2147483647, %v1004_v42 }
 0x433   : > { %v1062_v4 = vor.u32 1.1754944e-38, %v1061_v52  ;;  %vm1060_vm0 = vcmp.eq.f32.partialorder %v1059_v53, 8.507059e+37  ;;  %v1851_v52 = vld [vmem:[%s2509_s23] ss:$0 sm:$0xff] }
 0x437   : > { %v1869_v48 = vpop.eup %1868 }
 0x438   : > { %v998_v49 = vpop.xlane.xlu1 %997  ;;  %v1051_v50 = vmul.f32 %v1869_v48, %v1004_v42  ;;  %vm1056_vm10 = vweird.f32 %v1869_v48 }
 0x439   : > { %1870 = vrcp.f32 %v998_v49  ;;  %v1031_v58 = vand.u32 2147483648, %v998_v49  ;;  %v1029_v60 = vand.u32 2147483647, %v998_v49  ;;  %vm1025_vm11 = vweird.f32 %v998_v49  ;;  %vm1057_vm14 = vmor %vm1055_vm12, %vm1056_vm10 }
 0x43a   : > { %v1052_v51 = vsub.f32 1.0, %v1051_v50  ;;  %vm1169_vm12 = vcmask 195584  }
 0x43b   : > { %v1032_v63 = vor.u32 1.1754944e-38, %v1031_v58  ;;  %vm1030_vm15 = vcmp.eq.f32.partialorder %v1029_v60, 8.507059e+37 }
 0x43c   : > { %v1053_v56 = vmul.f32 %v1869_v48, %v1052_v51  ;;  %v1753_v51 = vld [vmem:[%s2508_s29 + $0x8] sm:$0xff] }
 0x43e   : > { %v1054_v61 = vadd.f32 %v1869_v48, %v1053_v56 }
 0x43f   : > { %v1871_v54 = vpop.eup %1870 }
 0x440   : > { %v1021_v55 = vmul.f32 %v1871_v54, %v998_v49  ;;  %vm1026_vm9 = vweird.f32 %v1871_v54  ;;  %v1058_v1 = vsel %vm1057_vm14, %v1869_v48, %v1054_v61 }
 0x441   : > { %vm1027_vm13 = vmor %vm1025_vm11, %vm1026_vm9  ;;  %v1063_v6 = vsel %vm1060_vm0, %v1062_v4, %v1058_v1 }
 0x442   : > { %v1022_v57 = vsub.f32 1.0, %v1021_v55  ;;  %v1064_v8 = vmul.f32 %v2294_v31, %v1063_v6 }
 0x444   : > { %v1023_v59 = vmul.f32 %v1871_v54, %v1022_v57  ;;  %v1068_v12 = vpack.c.bf16 %v1064_v8, %v1064_v8  ;;  %v1755_v8 = vld [vmem:[%s2220_s25 + $0x8] sm:$0xff] }
 0x445   : > { %1271 = vmatpush.bf16.msra.mxu2 %v1755_v8 }
 0x446   : > { %v1024_v62 = vadd.f32 %v1871_v54, %v1023_v59 }
 0x448   : > { %v1028_v0 = vsel %vm1027_vm13, %v1871_v54, %v1024_v62  ;;  %v1752_v54 = vld [vmem:[%s2508_s29] sm:$0xff]  ;;  %s1387_s29 = sld [smem:[#allocation4 + %s2512_s24]] (!%p1734_p1) }
 0x449   : > { %v1033_v2 = vsel %vm1030_vm15, %v1032_v63, %v1028_v0 }
 0x44a   : > { %v1034_v5 = vmul.f32 %v1863_v33, %v1033_v2 }
 0x44c   : > { %v1066_v7 = vpack.c.bf16 %v1034_v5, %v1034_v5 }
 0x44e   : > { %1680 = vmatmul.msk.bf16.vlgmr.msrb.gmra.mxu2 %vm869_vm6, %v1066_v7 }
 0x450   : > { %v1134_v9 = vpop.permute.xlu1 %1133 }
 0x451   : > { %v1139_v10 = vsel %vm1074_vm8, %v1134_v9, 0  ;;  %v1754_v9 = vld [vmem:[%s2220_s25] sm:$0xff] }
 0x452   : > { %1148 = vmatpush.bf16.msra.mxu0 %v1139_v10  ;;  %1272 = vmatpush.bf16.msra.mxu2 %v1754_v9 }
 0x455   : > { %1682 = vmatmul.msk.bf16.vlgmr.msra.gmra.mxu0 %vm869_vm6, %v1068_v12 }
 0x456   : > { %v1001_v13 = vpop.xlane.xlu2 %1000 }
 0x457   : > { %1872 = vrcp.f32 %v1001_v13  ;;  %v1046_v20 = vand.u32 2147483648, %v1001_v13  ;;  %v1044_v22 = vand.u32 2147483647, %v1001_v13  ;;  %vm1040_vm3 = vweird.f32 %v1001_v13 }
 0x459   : > { %v1047_v25 = vor.u32 1.1754944e-38, %v1046_v20  ;;  %vm1045_vm5 = vcmp.eq.f32.partialorder %v1044_v22, 8.507059e+37  ;;  %v1853_v22 = vld [vmem:[%s739_s5] ss:$0 sm:$0xff] }
 0x45d   : > { %v1873_v14 = vpop.eup %1872 }
 0x45e   : > { %v1036_v15 = vmul.f32 %v1873_v14, %v1001_v13  ;;  %v995_v16 = vpop.xlane.xlu0 %994  ;;  %v1113_v17 = vpop.permute.xlu2 %1112  ;;  %vm1041_vm2 = vweird.f32 %v1873_v14 }
 0x45f   : > { %1874 = vrcp.f32 %v995_v16  ;;  %v1118_v19 = vsel %vm1074_vm8, %v1113_v17, 0  ;;  %vm1042_vm4 = vmor %vm1040_vm3, %vm1041_vm2  ;;  %v1016_v33 = vand.u32 2147483648, %v995_v16  ;;  %v1014_v35 = vand.u32 2147483647, %v995_v16 }
 0x460   : > { %v1037_v18 = vsub.f32 1.0, %v1036_v15  ;;  %1127 = vmatpush.bf16.msrb.mxu3 %v1118_v19  ;;  %vm1010_vm9 = vweird.f32 %v995_v16  ;;  %v1852_v19 = vld [vmem:[%s2510_s12] ss:$0 sm:$0xff] }
 0x461   : > { %v1017_v38 = vor.u32 1.1754944e-38, %v1016_v33  ;;  %vm1015_vm11 = vcmp.eq.f32.partialorder %v1014_v35, 8.507059e+37  ;;  %v1757_v33 = vld [vmem:[%s2234_s28 + $0x8] sm:$0xff] }
 0x462   : > { %v1038_v21 = vmul.f32 %v1873_v14, %v1037_v18 }
 0x464   : > { %v1039_v23 = vadd.f32 %v1873_v14, %v1038_v21 }
 0x465   : > { %v1875_v24 = vpop.eup %1874 }
 0x466   : > { %v1006_v26 = vmul.f32 %v1875_v24, %v995_v16  ;;  %v1070_v27 = vpop.permute.xlu2 %1069  ;;  %v1043_v28 = vsel %vm1042_vm4, %v1873_v14, %v1039_v23  ;;  %vm1011_vm7 = vweird.f32 %v1875_v24 }
 0x467   : > { %v1076_v29 = vsel %vm1074_vm8, %v1070_v27, 0  ;;  %v1048_v30 = vsel %vm1045_vm5, %v1047_v25, %v1043_v28  ;;  %vm1012_vm10 = vmor %vm1010_vm9, %vm1011_vm7  ;;  %vm1167_vm8 = vcmask 130048   ;;  %v1762_v27 = vld [vmem:[%s2234_s28 + $0x30] sm:$0xff]  ;;  %v1761_v28 = vld [vmem:[%s2234_s28 + $0x28] sm:$0xff] }
 0x468   : > { %v1007_v31 = vsub.f32 1.0, %v1006_v26  ;;  %1085 = vmatpush.bf16.msrb.mxu1 %v1076_v29  ;;  %v1049_v32 = vmul.f32 %v2302_v43, %v1048_v30  ;;  %v1763_v26 = vld [vmem:[%s2234_s28 + $0x38] sm:$0xff]  ;;  %v1760_v29 = vld [vmem:[%s2234_s28 + $0x20] sm:$0xff] }
 0x469   : > { %1368 = vmatpush.bf16.msra.mxu3 %v1763_v26  ;;  %v1759_v30 = vld [vmem:[%s2234_s28 + $0x18] sm:$0xff] }
 0x46a   : > { %v1008_v34 = vmul.f32 %v1875_v24, %v1007_v31  ;;  %v1067_v36 = vpack.c.bf16 %v1049_v32, %v1049_v32  ;;  %v1758_v31 = vld [vmem:[%s2234_s28 + $0x10] sm:$0xff]  ;;  %v1854_v32 = vld [vmem:[%s747_s7] ss:$0 sm:$0xff] }
 0x46c   : > { %v1009_v37 = vadd.f32 %v1875_v24, %v1008_v34  ;;  %1681 = vmatmul.msk.bf16.vlgmr.msrb.gmra.mxu3 %vm869_vm6, %v1067_v36  ;;  %1201 = vmatpush.bf16.msra.mxu1 %v1753_v51  ;;  %v1756_v36 = vld [vmem:[%s2234_s28] sm:$0xff] }
 0x46d   : > { %1369 = vmatpush.bf16.msra.mxu3 %v1762_v27 }
 0x46e   : > { %v1013_v39 = vsel %vm1012_vm10, %v1875_v24, %v1009_v37 }
 0x46f   : > { %v1018_v40 = vsel %vm1015_vm11, %v1017_v38, %v1013_v39 }
 0x470   : > { %v1019_v41 = vmul.f32 %v2306_v46, %v1018_v40  ;;  %1202 = vmatpush.bf16.msra.mxu1 %v1752_v54 }
 0x471   : > { %1370 = vmatpush.bf16.msra.mxu3 %v1761_v28 }
 0x472   : > { %v1065_v44 = vpack.c.bf16 %v1019_v41, %v1019_v41 }
 0x474   : > { %1679 = vmatmul.msk.bf16.vlgmr.msrb.gmra.mxu1 %vm869_vm6, %v1065_v44 }
 0x475   : > { %1371 = vmatpush.bf16.msra.mxu3 %v1760_v29 }
 0x479   : > { %1372 = vmatpush.bf16.msra.mxu3 %v1759_v30 }
 0x47d   : > { %1373 = vmatpush.bf16.msra.mxu3 %v1758_v31 }
 0x481   : > { %1374 = vmatpush.bf16.msra.mxu3 %v1757_v33 }
 0x485   : > { %1375 = vmatpush.bf16.msra.mxu3 %v1756_v36 }
 0x4d1   : > { %v1108_v43 = vpop.f32.mrf.mxu2 }
 0x4d2   : > { %1155 = vrot.lane.b32.xlu1 %v1108_v43, %s2002_s17  ;;  %v1150_v45 = vpop.f32.mrf.mxu0  ;;  %s1388_s17 = scalar_lea.vmem (!%p1734_p1), [#allocation2], %s1387_s29 }
 0x4d9   : > { %v1110_v47 = vpop.f32.mrf.mxu2 }
 0x4da   : > { %1163 = vrot.lane.b32.xlu1 %v1150_v45, %s2003_s21  ;;  %v1152_v42 = vpop.f32.mrf.mxu0  ;;  %s2513_s21 = sld [smem:[#allocation30_spill]] (!%p1734_p1) }
 0x4ef   : > { %v1129_v48 = vpop.f32.mrf.mxu3 }
 0x4f0   : > { %1159 = vrot.lane.b32.xlu2 %v1129_v48, %s2004_s30  ;;  %s2514_s30 = smov (!%p1734_p1), %s2513_s21 }
 0x4f1   : > { %v1087_v49 = vpop.f32.mrf.mxu1 }
 0x4f7   : > { %v1131_v50 = vpop.f32.mrf.mxu3 }
 0x4f9   : > { %v1089_v46 = vpop.f32.mrf.mxu1 }
 0x544   : > { %v1156_v55 = vpop.permute.xlu1 %1155 }
 0x545   : > { %v1166_v56 = vsel %vm869_vm6, %v1087_v49, %v1156_v55 }
 0x54a   : > { %v1160_v57 = vpop.permute.xlu2 %1159 }
 0x54b   : > { %v1168_v58 = vsel %vm1167_vm8, %v1166_v56, %v1160_v57  ;;  %v1855_v56 = vld [vmem:[%s755_s0] ss:$0 sm:$0xff] }
 0x54c   : > { %v1164_v59 = vpop.permute.xlu1 %1163 }
 0x54d   : > { %v1170_v60 = vsel %vm1169_vm12, %v1168_v58, %v1164_v59 }
 0x54e   : > { %v1171_v61 = vpack.c.bf16 %v1170_v60, %v1170_v60 }
 0x550   : > { %1691 = vmatmul.msk.bf16.vlgmr.msra.gmra.mxu1 %vm775_vm1, %v1171_v61 }
 0x5cd   : > { %v1204_v62 = vpop.f32.mrf.mxu1 }
 0x5ce   : > { %v1205_v53 = vadd.f32 %v1851_v52, %v1204_v62 }
 0x5d0   : > { %v2334_v63 = vadd.f32 %v1205_v53, %v2244_v3 }
 0x5d2   : > { %v1211_v0 = vsel %vm775_vm1, %v2334_v63, 0.0 }
 0x5d3   : > { %1212 = vadd.xlane.f32.xlu2 %v1211_v0 }
 0x5d5   : > { %v1206_v1 = vpop.f32.mrf.mxu1 }
 0x646   : > { %v1213_v2 = vpop.xlane.xlu2 %1212 }
 0x647   : > { %v1214_v4 = vmul.f32 %v1213_v2, %v2248_v11 }
 0x649   : > { %v1215_v5 = vsub.f32 %v2334_v63, %v1214_v4 }
 0x64b   : > { %v1216_v6 = vmul.f32 %v1215_v5, %v1215_v5 }
 0x64d   : > { %v1217_v7 = vsel %vm775_vm1, %v1216_v6, 0.0 }
 0x64e   : > { %1218 = vadd.xlane.f32.xlu1 %v1217_v7 }
 0x6c1   : > { %v1219_v3 = vpop.xlane.xlu1 %1218 }
 0x6c2   : > { %v1220_v10 = vmul.f32 %v1219_v3, %v2248_v11 }
 0x6c4   : > { %v1221_v12 = vadd.f32 1e-05, %v1220_v10 }
 0x6c6   : > { %1876 = vrsqrt.f32 %v1221_v12  ;;  %vm1228_vm13 = vweird.f32 %v1221_v12 }
 0x6cc   : > { %v1877_v13 = vpop.eup %1876 }
 0x6cd   : > { %v1223_v14 = vmul.f32 %v1877_v13, %v1221_v12  ;;  %vm1229_vm6 = vweird.f32 %v1877_v13 }
 0x6ce   : > { %vm1230_vm14 = vmor %vm1228_vm13, %vm1229_vm6 }
 0x6cf   : > { %v1224_v15 = vmul.f32 %v1877_v13, %v1223_v14 }
 0x6d1   : > { %v1225_v16 = vmul.f32 0.5, %v1224_v15 }
 0x6d3   : > { %v1226_v17 = vsub.f32 1.5, %v1225_v16 }
 0x6d5   : > { %v1227_v18 = vmul.f32 %v1877_v13, %v1226_v17 }
 0x6d7   : > { %v1231_v20 = vsel %vm1230_vm14, %v1877_v13, %v1227_v18 }
 0x6d8   : > { %v1232_v21 = vmul.f32 %v1231_v20, %v1215_v5 }
 0x6da   : > { %v1236_v23 = vmul.f32 %v1852_v19, %v1232_v21 }
 0x6dc   : > { %v1240_v24 = vadd.f32 %v1853_v22, %v1236_v23 }
 0x6de   : > { %v1241_v25 = vpack.c.bf16 %v1240_v24, %v1240_v24 }
 0x6e0   : > { %1700 = vmatmul.msk.bf16.vlgmr.msra.gmra.mxu2 %vm775_vm1, %v1241_v25 }
 0x763   : > { %v1274_v34 = vpop.f32.mrf.mxu2 }
 0x764   : > { %v1275_v35 = vadd.f32 %v1854_v32, %v1274_v34 }
 0x766   : > { %v1701_v37 = vmul.f32 -1.702, %v1275_v35 }
 0x768   : > { %v1280_v38 = vmul.f32 1.442695, %v1701_v37 }
 0x76a   : > { %1878 = vpow2.f32 %v1280_v38 }
 0x76b   : > { %v1276_v39 = vpop.f32.mrf.mxu2 }
 0x770   : > { %v1879_v40 = vpop.eup %1878 }
 0x771   : > { %v1282_v41 = vadd.f32 1.0, %v1879_v40 }
 0x773   : > { %1880 = vrcp.f32 %v1282_v41  ;;  %v1294_v47 = vand.u32 2147483648, %v1282_v41  ;;  %v1292_v48 = vand.u32 2147483647, %v1282_v41  ;;  %vm1288_vm0 = vweird.f32 %v1282_v41 }
 0x775   : > { %v1295_v50 = vor.u32 1.1754944e-38, %v1294_v47  ;;  %vm1293_vm3 = vcmp.eq.f32.partialorder %v1292_v48, 8.507059e+37 }
 0x779   : > { %v1881_v44 = vpop.eup %1880 }
 0x77a   : > { %v1284_v43 = vmul.f32 %v1881_v44, %v1282_v41  ;;  %vm1289_vm15 = vweird.f32 %v1881_v44 }
 0x77b   : > { %vm1290_vm2 = vmor %vm1288_vm0, %vm1289_vm15 }
 0x77c   : > { %v1285_v45 = vsub.f32 1.0, %v1284_v43 }
 0x77e   : > { %v1286_v42 = vmul.f32 %v1881_v44, %v1285_v45 }
 0x780   : > { %v1287_v49 = vadd.f32 %v1881_v44, %v1286_v42 }
 0x782   : > { %v1291_v46 = vsel %vm1290_vm2, %v1881_v44, %v1287_v49 }
 0x783   : > { %v1296_v51 = vsel %vm1293_vm3, %v1295_v50, %v1291_v46 }
 0x784   : > { %v1298_v54 = vmul.f32 %v1296_v51, %v1275_v35 }
 0x786   : > { %v1299_v55 = vpack.c.bf16 %v1298_v54, %v1298_v54 }
 0x788   : > { %1376 = vmatmul.bf16.vlgmr.msra.gmra.mxu3 %v1299_v55 }
 0x80b   : > { %v1377_v57 = vpop.f32.mrf.mxu3 }
 0x80c   : > { %v1378_v58 = vadd.f32 %v1855_v56, %v1377_v57 }
 0x80e   : > { %v1381_v59 = vadd.f32 %v1378_v58, %v2334_v63 }
 0x80f   : > { %1386 = sbr.rel (%p1734_p1) target bundleno = 2476 (0x9ac), region = 96 }
 0x810   : > { %1382 = vst.msk [vmem:[#allocation2] sm:$0xff] %vm775_vm1, %v1381_v59 }
 0x813   : > { %v1379_v60 = vpop.f32.mrf.mxu3 }
 0x814   : > { %vm1392_vm4 = vcmask 253952   ;;  %v1765_v63 = vld [vmem:[%s2513_s21 + $0x8] sm:$0xff]  ;;  %v1764_v4 = vld [vmem:[%s2514_s30] sm:$0xff] }
 0x815   : > { %1443 = vmatpush.bf16.msra.mxu0 %v1765_v63  ;;  %v1390_v14 = vld [vmem:[%s2515_s27] sm:$0x1] }
 0x817   : > { %v1389_v61 = vld [vmem:[%s1388_s17] sm:$0x1] }
 0x818   : > { %v1393_v52 = vsel %vm1392_vm4, %v1389_v61, 0.0 }
 0x819   : > { %1394 = vadd.xlane.f32.xlu0 %v1393_v52  ;;  %1444 = vmatpush.bf16.msra.mxu0 %v1764_v4 }
 0x88c   : > { %v1395_v62 = vpop.xlane.xlu0 %1394 }
 0x88d   : > { %v1396_v53 = vmul.f32 %v1395_v62, %v2248_v11 }
 0x88f   : > { %v1397_v0 = vsub.f32 %v1389_v61, %v1396_v53 }
 0x891   : > { %v1398_v1 = vmul.f32 %v1397_v0, %v1397_v0 }
 0x893   : > { %v1399_v2 = vsel %vm1392_vm4, %v1398_v1, 0.0 }
 0x894   : > { %1400 = vadd.xlane.f32.xlu0 %v1399_v2 }
 0x907   : > { %v1401_v5 = vpop.xlane.xlu0 %1400 }
 0x908   : > { %v1402_v6 = vmul.f32 %v1401_v5, %v2248_v11  ;;  %v1391_v11 = vld [vmem:[%s2516_s15] sm:$0x1] }
 0x90a   : > { %v1403_v7 = vadd.f32 1e-05, %v1402_v6 }
 0x90c   : > { %1882 = vrsqrt.f32 %v1403_v7  ;;  %vm1410_vm7 = vweird.f32 %v1403_v7 }
 0x912   : > { %v1883_v8 = vpop.eup %1882 }
 0x913   : > { %v1405_v9 = vmul.f32 %v1883_v8, %v1403_v7  ;;  %vm1411_vm5 = vweird.f32 %v1883_v8 }
 0x914   : > { %vm1412_vm9 = vmor %vm1410_vm7, %vm1411_vm5 }
 0x915   : > { %v1406_v3 = vmul.f32 %v1883_v8, %v1405_v9 }
 0x917   : > { %v1407_v10 = vmul.f32 0.5, %v1406_v3 }
 0x919   : > { %v1408_v12 = vsub.f32 1.5, %v1407_v10 }
 0x91b   : > { %v1409_v13 = vmul.f32 %v1883_v8, %v1408_v12 }
 0x91d   : > { %v1413_v15 = vsel %vm1412_vm9, %v1883_v8, %v1409_v13 }
 0x91e   : > { %v1414_v16 = vmul.f32 %v1413_v15, %v1397_v0 }
 0x920   : > { %v1415_v17 = vmul.f32 %v1414_v16, %v1390_v14 }
 0x922   : > { %v1416_v18 = vadd.f32 %v1415_v17, %v1391_v11 }
 0x924   : > { %v1417_v19 = vpack.c.bf16 %v1416_v18, %v1416_v18 }
 0x926   : > { %1743 = vmatmul.msk.bf16.vlgmr.msra.gmra.mxu0 %vm775_vm1, %v1417_v19 }
 0x9a3   : > { %v1446_v20 = vpop.f32.mrf.mxu0 }
 0x9a4   : > { %1450 = vst [vmem:[%s2238_s16] sm:$0x1] %v1446_v20 }
 0x9ab   : > { %v1448_v21 = vpop.f32.mrf.mxu0 }
 0x9ac PF: > { %s2517_s4 = sld [smem:[#allocation11_spill]]  ;;  %s1462_s24 = sshll.u32 %s2238_s16, 4  ;;  %s1463_s24 = int_to_ptr.vmem [resolvable:$true] %s1462_s24 }
 0x9ad   : > { %s2518_s26 = sld [smem:[#allocation31_spill]]  ;;  %s2520_s17 = sand.u32 1, %s1968_s19  }
 0x9ae   : > { %s1452_s22 = scalar_lea.sflag [#allocation6], %s2520_s17 }
 0x9b3   : > { %s1460_s28 = scalar_lea.hbm %s2518_s26, %s2517_s4  ;;  %s1916_s1 = scalar_lea.hbm %s2518_s26, 2 }
 0x9b4   : > { %s1464_s29 = sshll.u32 %s1460_s28, 4  ;;  %s1465_s29 = int_to_ptr.hbm [resolvable:$true] %s1464_s29 }
 0x9b5   : > { %s1910_s0 = sshra.s32 %s1465_s29, 4  ;;  %s1911_s0 = int_to_ptr.hbm [resolvable:$true] %s1910_s0 }
 0x9b6   : > { %s1912_s21 = scalar_lea.hbm %s1911_s0, 1  ;;  %p1917_p6 = scmp.lt.s32.totalorder %s1911_s0, %s2518_s26 }
 0x9b7   : > { %p1913_p2 = scmp.ne.s32.totalorder %s1911_s0, %s1912_s21  ;;  %p1918_p7 = scmp.lt.s32.totalorder %s1916_s1, %s1912_s21 }
 0x9b9   : > { %p1914_p4 = pnand %p1913_p2, %p2152_p3  ;;  %p1919_p8 = por %p1918_p7, %p1917_p6 }
 0x9bb   : > { %p1915_p5 = pneg %p1914_p4 }
 0x9bd   : > { %p1920_p10 = pnand %p1919_p8, %p1915_p5 }
 0x9bf   : > { %1923 = shalt.err (!%p1920_p10)
}
 0x9c0   : > { %1766 = dma.vmem_to_hbm [thread:$0]  (%p2152_p3), %s1463_s24, 16, %s1465_s29, %s1452_s22  }
 0x9c1 PF: > { %s2521_s16 = sld [smem:[#allocation14_spill]] }
 0x9c2   : > { %s2522_s25 = sld [smem:[#allocation9_spill]] }
 0x9c7   : > { %p1772_p11 = scmp.ge.s32.totalorder %s2521_s16, 2 }
 0x9c8   : > { %s1476_s15 = sand.u32 1, %s2522_s25  }
 0x9c9   : > { %p1769_p12 = pnand %p1772_p11, %p2162_p9  ;;  %s1477_s4 = scalar_lea.sflag [#allocation6], %s1476_s15 }
 0x9cb   : > { %p1770_p13 = pneg %p1769_p12 }
 0x9cd   : > { %1959 = dma.done.wait (%p1770_p13), %s1477_s4, 16  }
 0x9ce   : > { %1961 = vsyncadd (%p1770_p13), %s1477_s4, 4294967280  ;;  %s39_s12 = sadd.s32 1, %s2521_s16   ;;  %s2524_s5 = sld [smem:[#allocation10_spill]] }
 0x9cf   : > { %p36_p0 = scmp.ge.s32.totalorder %s39_s12, 6   ;;  %s2525_s1 = sld [smem:[#allocation19_spill]] }
 0x9d0   : > { %s2526_s20 = sld [smem:[#allocation12_spill]]  ;;  %s2530_s0 = smov %s1968_s19 }
 0x9d1   : > { %s2527_s21 = sld [smem:[#allocation13_spill]]  ;;  %38 = sbr.rel (!%p36_p0) target bundleno = 28 (0x1c), region = 168 }
 0x9d2   : > { %s2528_s22 = sld [smem:[#allocation15_spill]] }
 0x9d3   : > { %s2529_s2 = sld [smem:[#allocation17_spill]] }
 0x9d4   : > { %s2531_s19 = smov %s2524_s5 }
 0x9d6   :  { %1482 = vsyncpa [#allocation6], 1 }
 0x9d7   :  { %1484 = vsyncpa [#allocation6 + $0x1], 1 }

</bundles_post_ra>
